<compile_context>
chip_gen: v7x
topology: tpu7x:2x2x1
jax: 0.10.0
libtpu: 0.0.40
codegen_flags: <defaults>
</compile_context>

<pallas_src>
import jax
import jax.numpy as jnp
import numpy as np
from jax.experimental import pallas as pl
from jax.experimental.pallas import tpu as pltpu


# --------------------------------------------------------------------------
# Pallas kernel: whole forward pass for one batch tile (4 fused matmuls).
# --------------------------------------------------------------------------
def net_kernel(x_ref, w1_ref, b1_ref, w2_ref, b2_ref, w3_ref, b3_ref,
               w4_ref, b4_ref, o_ref):
    # x_ref : (TB, IH*IW*Cin) bf16 -- lane-dense flattened NHWC board
    # w*_ref: zero-structured fused weights, bf16; b*_ref: f32 (1, N)
    # o_ref : (TB, 128) bf16       -- fc1 logits, lane-padded
    x = x_ref[...]

    h1 = jnp.maximum(
        jnp.dot(x, w1_ref[...], preferred_element_type=jnp.float32) + b1_ref[...],
        0.0).astype(jnp.bfloat16)                                    # (TB, 1152)

    h2 = jnp.maximum(
        jnp.dot(h1, w2_ref[...], preferred_element_type=jnp.float32) + b2_ref[...],
        0.0).astype(jnp.bfloat16)                                    # (TB, 256)

    h3 = jnp.maximum(
        jnp.dot(h2, w3_ref[...], preferred_element_type=jnp.float32) + b3_ref[...],
        0.0).astype(jnp.bfloat16)                                    # (TB, 128)

    o_ref[...] = (jnp.dot(h3, w4_ref[...], preferred_element_type=jnp.float32)
                  + b4_ref[...]).astype(o_ref.dtype)                 # (TB, 128)


# --------------------------------------------------------------------------
# One-time parameter re-layout: PyTorch OIHW / (out,in) -> fused matmul form.
# Spatial structure is encoded as zero blocks so taps fold into K and output
# positions fold into N; built with numpy once, cast to bf16.
# --------------------------------------------------------------------------
def prepare_params(params, matmul_dtype=jnp.bfloat16):
    w1, b1, w2, b2, w3, b3, w4, b4 = (np.asarray(p, dtype=np.float32) for p in params)
    C1, Cin, KH, KW = w1.shape          # (128, obs, 2, 2)
    C2 = w2.shape[0]                    # 64
    C3 = w3.shape[0]                    # 16
    A = w4.shape[0]                     # n_actions
    IH = IW = 4
    OH1, OW1 = IH - KH + 1, IW - KW + 1      # 3, 3
    OH2, OW2 = OH1 - KH + 1, OW1 - KW + 1    # 2, 2

    # conv1: rows = (h*IW + w)*Cin + ci ; cols = (oi*OW1 + oj)*C1 + co
    w1c = np.zeros((IH * IW * Cin, OH1 * OW1 * C1), np.float32)
    for oi in range(OH1):
        for oj in range(OW1):
            for di in range(KH):
                for dj in range(KW):
                    h, w = oi + di, oj + dj
                    r0 = (h * IW + w) * Cin
                    c0 = (oi * OW1 + oj) * C1
                    w1c[r0:r0 + Cin, c0:c0 + C1] = w1[:, :, di, dj].T
    b1c = np.tile(b1, OH1 * OW1)[None, :]

    # conv2: rows = (oi*OW1 + oj)*C1 + ci ; cols = (pi*OW2 + pj)*C2 + co
    w2c = np.zeros((OH1 * OW1 * C1, OH2 * OW2 * C2), np.float32)
    for pi in range(OH2):
        for pj in range(OW2):
            for di in range(KH):
                for dj in range(KW):
                    oi, oj = pi + di, pj + dj
                    r0 = (oi * OW1 + oj) * C1
                    c0 = (pi * OW2 + pj) * C2
                    w2c[r0:r0 + C1, c0:c0 + C2] = w2[:, :, di, dj].T
    b2c = np.tile(b2, OH2 * OW2)[None, :]

    # conv3 (2x2 -> 1x1): rows = (pi*OW2 + pj)*C2 + ci ; output padded to 128.
    C3P = 128
    w3c = np.zeros((OH2 * OW2 * C2, C3P), np.float32)
    for pi in range(KH):
        for pj in range(KW):
            r0 = (pi * OW2 + pj) * C2
            w3c[r0:r0 + C2, :C3] = w3[:, :, pi, pj].T
    b3c = np.zeros((1, C3P), np.float32)
    b3c[0, :C3] = b3

    # fc1: (128, 128); padded conv3 channels hit zero weight rows, padded
    # action columns are sliced off in the wrapper.
    AP = 128
    w4p = np.zeros((C3P, AP), np.float32)
    w4p[:C3, :A] = w4.T
    b4p = np.zeros((1, AP), np.float32)
    b4p[0, :A] = b4

    return {
        "w1": jnp.asarray(w1c, matmul_dtype), "b1": jnp.asarray(b1c, jnp.float32),
        "w2": jnp.asarray(w2c, matmul_dtype), "b2": jnp.asarray(b2c, jnp.float32),
        "w3": jnp.asarray(w3c, matmul_dtype), "b3": jnp.asarray(b3c, jnp.float32),
        "w4": jnp.asarray(w4p, matmul_dtype), "b4": jnp.asarray(b4p, jnp.float32),
        "n_actions": A, "pad_cols": AP,
    }


def _round_up(v, m):
    return -(-v // m) * m


# --------------------------------------------------------------------------
# Wrapper: batch-gridded pallas_call.
# --------------------------------------------------------------------------
def net_forward(x_nhwc, prep, tile_b=512):
    """x_nhwc: (B, 4, 4, obs) float32 NHWC.  prep: output of prepare_params()."""
    B, IH, IW, Cin = x_nhwc.shape
    A, AP = prep["n_actions"], prep["pad_cols"]
    K1 = IH * IW * Cin

    # Clamp the tile to the batch (no wasted rows for tiny B) and aim for at
    # least 2 grid steps so both v7x TensorCores get work; keep >= 8 rows for
    # the (8,128) sublane rule.
    tb = min(tile_b, max(8, _round_up(-(-B // 2), 8)))
    Bp = _round_up(B, tb)

    x = x_nhwc.reshape(B, K1).astype(jnp.bfloat16)     # lane-dense flatten
    if Bp != B:
        x = jnp.pad(x, ((0, Bp - B), (0, 0)))          # padding rows sliced off below

    grid = (Bp // tb,)

    def const(i):        # weights/biases stay VMEM-resident across the grid
        return (0, 0)

    in_specs = [
        pl.BlockSpec((tb, K1), lambda i: (i, 0)),      # x  (lane-dense)
        pl.BlockSpec(prep["w1"].shape, const),         # (256, 1152)
        pl.BlockSpec(prep["b1"].shape, const),         # (1, 1152)
        pl.BlockSpec(prep["w2"].shape, const),         # (1152, 256)
        pl.BlockSpec(prep["b2"].shape, const),         # (1, 256)
        pl.BlockSpec(prep["w3"].shape, const),         # (256, 128)
        pl.BlockSpec(prep["b3"].shape, const),         # (1, 128)
        pl.BlockSpec(prep["w4"].shape, const),         # (128, 128)
        pl.BlockSpec(prep["b4"].shape, const),         # (1, 128)
    ]
    out_specs = pl.BlockSpec((tb, AP), lambda i: (i, 0))

    out_padded = pl.pallas_call(
        net_kernel,
        out_shape=jax.ShapeDtypeStruct((Bp, AP), jnp.bfloat16),   # bf16 writeback
        grid=grid,
        in_specs=in_specs,
        out_specs=out_specs,
        compiler_params=pltpu.CompilerParams(
            dimension_semantics=("parallel",),    # shard batch grid across v7x TCs
            vmem_limit_bytes=32 * 1024 * 1024,    # ~8 MiB live at tile_b=512
        ),
    )(x, prep["w1"], prep["b1"], prep["w2"], prep["b2"],
      prep["w3"], prep["b3"], prep["w4"], prep["b4"])

    return out_padded[:B, :A].astype(jnp.float32)


# --------------------------------------------------------------------------
# Pure-JAX reference (PyTorch semantics, f32) for verification.
# --------------------------------------------------------------------------
def net_reference(x_nhwc, params):
    w1, b1, w2, b2, w3, b3, w4, b4 = params
    x = jnp.transpose(x_nhwc, (0, 3, 1, 2))   # NHWC -> NCHW (matches x.permute)

    def conv(x, w, b):
        y = jax.lax.conv_general_dilated(
            x, w, window_strides=(1, 1), padding='VALID',
            dimension_numbers=('NCHW', 'OIHW', 'NCHW'))
        return jax.nn.relu(y + b[None, :, None, None])

    x = conv(x, w1, b1)
    x = conv(x, w2, b2)
    x = conv(x, w3, b3)
    x = x.reshape(x.shape[0], -1)
    return x @ w4.T + b4


# --------------------------------------------------------------------------
if __name__ == "__main__":
    B, HW, OBS, ACT = 2, 4, 16, 4   # batch=2, 4x4 board, 16 obs channels, 4 actions

    key = jax.random.PRNGKey(0)
    ks = jax.random.split(key, 9)

    def rnd(k, shape, scale=0.1):
        return jax.random.normal(k, shape, dtype=jnp.float32) * scale

    # PyTorch-layout parameters (deterministic synthetic init).
    params = (
        rnd(ks[0], (128, OBS, 2, 2)), rnd(ks[1], (128,)),   # conv1
        rnd(ks[2], (64, 128, 2, 2)),  rnd(ks[3], (64,)),    # conv2
        rnd(ks[4], (16, 64, 2, 2)),   rnd(ks[5], (16,)),    # conv3
        rnd(ks[6], (ACT, 16)),        rnd(ks[7], (ACT,)),   # fc1
    )

    x = jax.random.normal(ks[8], (B, HW, HW, OBS), dtype=jnp.float32)

    prep = prepare_params(params)                  # one-time weight re-layout
    out = jax.block_until_ready(net_forward(x, prep, tile_b=512))
    ref = jax.block_until_ready(net_reference(x, params))

    assert out.shape == (B, ACT), out.shape
    # bf16 matmul operands / activations (f32 accumulation) -> ~1e-2 deviation.
    np.testing.assert_allclose(np.asarray(out), np.asarray(ref),
                               rtol=5e-2, atol=5e-2)
    print("KERNEL_OK")
</pallas_src>

<mosaic_0001>
module attributes {stable_mosaic.version = 11 : i64} {
  func.func @net_kernel(%arg0: i32, %arg1: memref<8x256xbf16, #tpu.memory_space<vmem>>, %arg2: memref<256x1152xbf16, #tpu.memory_space<vmem>>, %arg3: memref<1x1152xf32, #tpu.memory_space<vmem>>, %arg4: memref<1152x256xbf16, #tpu.memory_space<vmem>>, %arg5: memref<1x256xf32, #tpu.memory_space<vmem>>, %arg6: memref<256x128xbf16, #tpu.memory_space<vmem>>, %arg7: memref<1x128xf32, #tpu.memory_space<vmem>>, %arg8: memref<128x128xbf16, #tpu.memory_space<vmem>>, %arg9: memref<1x128xf32, #tpu.memory_space<vmem>>, %arg10: memref<8x128xbf16, #tpu.memory_space<vmem>>) attributes {dimension_semantics = [#tpu.dimension_semantics<parallel>], iteration_bounds = array<i64: 1>, scalar_prefetch = 0 : i64, scratch_operands = 0 : i64, tpu.core_type = #tpu.core_type<tc>, window_params = [{transform_indices = @transform_0, window_bounds = array<i64: 8, 256>}, {pipeline_mode = #tpu.pipeline_mode<synchronous>, transform_indices = @transform_1, window_bounds = array<i64: 256, 1152>}, {pipeline_mode = #tpu.pipeline_mode<synchronous>, transform_indices = @transform_2, window_bounds = array<i64: 1, 1152>}, {pipeline_mode = #tpu.pipeline_mode<synchronous>, transform_indices = @transform_3, window_bounds = array<i64: 1152, 256>}, {pipeline_mode = #tpu.pipeline_mode<synchronous>, transform_indices = @transform_4, window_bounds = array<i64: 1, 256>}, {pipeline_mode = #tpu.pipeline_mode<synchronous>, transform_indices = @transform_5, window_bounds = array<i64: 256, 128>}, {pipeline_mode = #tpu.pipeline_mode<synchronous>, transform_indices = @transform_6, window_bounds = array<i64: 1, 128>}, {pipeline_mode = #tpu.pipeline_mode<synchronous>, transform_indices = @transform_7, window_bounds = array<i64: 128, 128>}, {pipeline_mode = #tpu.pipeline_mode<synchronous>, transform_indices = @transform_8, window_bounds = array<i64: 1, 128>}, {transform_indices = @transform_9, window_bounds = array<i64: 8, 128>}]} {
    %c0 = arith.constant 0 : index
    %c0_0 = arith.constant 0 : index
    %0 = vector.load %arg1[%c0, %c0_0] : memref<8x256xbf16, #tpu.memory_space<vmem>>, vector<8x256xbf16>
    %c0_1 = arith.constant 0 : index
    %c0_2 = arith.constant 0 : index
    %1 = vector.load %arg2[%c0_1, %c0_2] : memref<256x1152xbf16, #tpu.memory_space<vmem>>, vector<256x1152xbf16>
    %cst = arith.constant dense<0.000000e+00> : vector<8x1152xf32>
    %2 = tpu.matmul %0, %1, %cst {dimension_numbers = #tpu.dot_dimension_numbers<[1], [0], [0], [1], [0, 0, 1, 1], [], []>} : vector<8x256xbf16>, vector<256x1152xbf16>, vector<8x1152xf32> -> vector<8x1152xf32>
    %c0_3 = arith.constant 0 : index
    %c0_4 = arith.constant 0 : index
    %3 = vector.load %arg3[%c0_3, %c0_4] : memref<1x1152xf32, #tpu.memory_space<vmem>>, vector<1x1152xf32>
    %4 = vector.broadcast %3 : vector<1x1152xf32> to vector<8x1152xf32>
    %5 = arith.addf %2, %4 : vector<8x1152xf32>
    %cst_5 = arith.constant 0.000000e+00 : f32
    %6 = vector.broadcast %cst_5 : f32 to vector<8x1152xf32>
    %7 = arith.maximumf %5, %6 : vector<8x1152xf32>
    %8 = arith.truncf %7 : vector<8x1152xf32> to vector<8x1152xbf16>
    %c0_6 = arith.constant 0 : index
    %c0_7 = arith.constant 0 : index
    %9 = vector.load %arg4[%c0_6, %c0_7] : memref<1152x256xbf16, #tpu.memory_space<vmem>>, vector<1152x256xbf16>
    %cst_8 = arith.constant dense<0.000000e+00> : vector<8x256xf32>
    %10 = tpu.matmul %8, %9, %cst_8 {dimension_numbers = #tpu.dot_dimension_numbers<[1], [0], [0], [1], [0, 0, 1, 1], [], []>} : vector<8x1152xbf16>, vector<1152x256xbf16>, vector<8x256xf32> -> vector<8x256xf32>
    %c0_9 = arith.constant 0 : index
    %c0_10 = arith.constant 0 : index
    %11 = vector.load %arg5[%c0_9, %c0_10] : memref<1x256xf32, #tpu.memory_space<vmem>>, vector<1x256xf32>
    %12 = vector.broadcast %11 : vector<1x256xf32> to vector<8x256xf32>
    %13 = arith.addf %10, %12 : vector<8x256xf32>
    %cst_11 = arith.constant 0.000000e+00 : f32
    %14 = vector.broadcast %cst_11 : f32 to vector<8x256xf32>
    %15 = arith.maximumf %13, %14 : vector<8x256xf32>
    %16 = arith.truncf %15 : vector<8x256xf32> to vector<8x256xbf16>
    %c0_12 = arith.constant 0 : index
    %c0_13 = arith.constant 0 : index
    %17 = vector.load %arg6[%c0_12, %c0_13] : memref<256x128xbf16, #tpu.memory_space<vmem>>, vector<256x128xbf16>
    %cst_14 = arith.constant dense<0.000000e+00> : vector<8x128xf32>
    %18 = tpu.matmul %16, %17, %cst_14 {dimension_numbers = #tpu.dot_dimension_numbers<[1], [0], [0], [1], [0, 0, 1, 1], [], []>} : vector<8x256xbf16>, vector<256x128xbf16>, vector<8x128xf32> -> vector<8x128xf32>
    %c0_15 = arith.constant 0 : index
    %c0_16 = arith.constant 0 : index
    %19 = vector.load %arg7[%c0_15, %c0_16] : memref<1x128xf32, #tpu.memory_space<vmem>>, vector<1x128xf32>
    %20 = vector.broadcast %19 : vector<1x128xf32> to vector<8x128xf32>
    %21 = arith.addf %18, %20 : vector<8x128xf32>
    %cst_17 = arith.constant 0.000000e+00 : f32
    %22 = vector.broadcast %cst_17 : f32 to vector<8x128xf32>
    %23 = arith.maximumf %21, %22 : vector<8x128xf32>
    %24 = arith.truncf %23 : vector<8x128xf32> to vector<8x128xbf16>
    %c0_18 = arith.constant 0 : index
    %c0_19 = arith.constant 0 : index
    %25 = vector.load %arg8[%c0_18, %c0_19] : memref<128x128xbf16, #tpu.memory_space<vmem>>, vector<128x128xbf16>
    %cst_20 = arith.constant dense<0.000000e+00> : vector<8x128xf32>
    %26 = tpu.matmul %24, %25, %cst_20 {dimension_numbers = #tpu.dot_dimension_numbers<[1], [0], [0], [1], [0, 0, 1, 1], [], []>} : vector<8x128xbf16>, vector<128x128xbf16>, vector<8x128xf32> -> vector<8x128xf32>
    %c0_21 = arith.constant 0 : index
    %c0_22 = arith.constant 0 : index
    %27 = vector.load %arg9[%c0_21, %c0_22] : memref<1x128xf32, #tpu.memory_space<vmem>>, vector<1x128xf32>
    %28 = vector.broadcast %27 : vector<1x128xf32> to vector<8x128xf32>
    %29 = arith.addf %26, %28 : vector<8x128xf32>
    %30 = arith.truncf %29 : vector<8x128xf32> to vector<8x128xbf16>
    %c0_23 = arith.constant 0 : index
    %c0_24 = arith.constant 0 : index
    %31 = vector.load %arg10[%c0_23, %c0_24] : memref<8x128xbf16, #tpu.memory_space<vmem>>, vector<8x128xbf16>
    tpu.vector_store %arg10[%c0_23, %c0_24], %30 {strides = array<i32>} : memref<8x128xbf16, #tpu.memory_space<vmem>>, vector<8x128xbf16>,
    return
  }
  func.func @transform_0(%arg0: i32) -> (i32, i32) {
    %c0_i32 = arith.constant 0 : i32
    %c0_i32_0 = arith.constant 0 : i32
    return %arg0, %c0_i32 : i32, i32
  }
  func.func @transform_1(%arg0: i32) -> (i32, i32) {
    %c0_i32 = arith.constant 0 : i32
    %c0_i32_0 = arith.constant 0 : i32
    %c0_i32_1 = arith.constant 0 : i32
    return %c0_i32, %c0_i32_0 : i32, i32
  }
  func.func @transform_2(%arg0: i32) -> (i32, i32) {
    %c0_i32 = arith.constant 0 : i32
    %c0_i32_0 = arith.constant 0 : i32
    %c0_i32_1 = arith.constant 0 : i32
    return %c0_i32, %c0_i32_0 : i32, i32
  }
  func.func @transform_3(%arg0: i32) -> (i32, i32) {
    %c0_i32 = arith.constant 0 : i32
    %c0_i32_0 = arith.constant 0 : i32
    %c0_i32_1 = arith.constant 0 : i32
    return %c0_i32, %c0_i32_0 : i32, i32
  }
  func.func @transform_4(%arg0: i32) -> (i32, i32) {
    %c0_i32 = arith.constant 0 : i32
    %c0_i32_0 = arith.constant 0 : i32
    %c0_i32_1 = arith.constant 0 : i32
    return %c0_i32, %c0_i32_0 : i32, i32
  }
  func.func @transform_5(%arg0: i32) -> (i32, i32) {
    %c0_i32 = arith.constant 0 : i32
    %c0_i32_0 = arith.constant 0 : i32
    %c0_i32_1 = arith.constant 0 : i32
    return %c0_i32, %c0_i32_0 : i32, i32
  }
  func.func @transform_6(%arg0: i32) -> (i32, i32) {
    %c0_i32 = arith.constant 0 : i32
    %c0_i32_0 = arith.constant 0 : i32
    %c0_i32_1 = arith.constant 0 : i32
    return %c0_i32, %c0_i32_0 : i32, i32
  }
  func.func @transform_7(%arg0: i32) -> (i32, i32) {
    %c0_i32 = arith.constant 0 : i32
    %c0_i32_0 = arith.constant 0 : i32
    %c0_i32_1 = arith.constant 0 : i32
    return %c0_i32, %c0_i32_0 : i32, i32
  }
  func.func @transform_8(%arg0: i32) -> (i32, i32) {
    %c0_i32 = arith.constant 0 : i32
    %c0_i32_0 = arith.constant 0 : i32
    %c0_i32_1 = arith.constant 0 : i32
    return %c0_i32, %c0_i32_0 : i32, i32
  }
  func.func @transform_9(%arg0: i32) -> (i32, i32) {
    %c0_i32 = arith.constant 0 : i32
    %c0_i32_0 = arith.constant 0 : i32
    return %arg0, %c0_i32 : i32, i32
  }
}

</mosaic_0001>

<bundles_post_ra>
// kernel: tpu_custom_call.1
= control target key start
LH: loop header
LB: loop body
LE: loop exit
PB: predicated region body
PF: predicated region fallthrough
CT: control target
= control target key end

     0   :  { %14 = vsyncpa [#allocation3], 0  ;;  %s3923_s0 = inlined_call_operand.hbm [shape: bf16[8,256], index: 0, kind: input, shape index: {}]   ;;  %s3924_s1 = inlined_call_operand.hbm [shape: bf16[256,1152], index: 1, kind: input, shape index: {}]   ;;  %s3925_s2 = inlined_call_operand.hbm [shape: f32[1,1152], index: 2, kind: input, shape index: {}]   ;;  %s3926_s3 = inlined_call_operand.hbm [shape: bf16[1152,256], index: 3, kind: input, shape index: {}]   ;;  %s3927_s4 = inlined_call_operand.vmem [shape: f32[1,256], index: 4, kind: input, shape index: {}]   ;;  %s3928_s5 = inlined_call_operand.hbm [shape: bf16[256,128], index: 5, kind: input, shape index: {}]   ;;  %s3929_s6 = inlined_call_operand.vmem [shape: f32[1,128], index: 6, kind: input, shape index: {}]   ;;  %s3930_s7 = inlined_call_operand.hbm [shape: bf16[128,128], index: 7, kind: input, shape index: {}]   ;;  %s3931_s8 = inlined_call_operand.vmem [shape: f32[1,128], index: 8, kind: input, shape index: {}]   ;;  %s3932_s9 = inlined_call_operand.hbm [shape: bf16[8,128], index: 9, kind: output, shape index: {}]  }
   0x1   :  { %15 = vsyncpa [#allocation6], 0 }
   0x2   :  { %16 = vsyncpa [#allocation9], 0 }
   0x3   :  { %17 = vsyncpa [#allocation12], 0 }
   0x4   :  { %18 = vsyncpa [#allocation4], 0  ;;  %s3716_s30 = smov [#allocation5]   ;;  %s3552_s13 = scalar_lea.hbm %s3924_s1, 18432 }
   0x5   :  { %s34_s10 = sshll.u32 %s3716_s30, 4  ;;  %p3553_p0 = scmp.ne.s32.totalorder %s3924_s1, %s3552_s13  ;;  %s35_s10 = int_to_ptr.vmem [resolvable:$true] %s34_s10 }
   0x6   :  { %p3556_p1 = scmp.lt.u32.totalorder %s3552_s13, %s3924_s1 }
   0x8   :  { %p3558_p2 = pnand %p3556_p1, %p3553_p0 }
   0xa   :  { %3561 = shalt.err (!%p3558_p2)
}
   0xb   :  { %s3562_s18 = scalar_lea.vmem %s35_s10, 18432  ;;  %p3567_p4 = scmp.lt.s32.totalorder %s35_s10, %s35_s10 }
   0xc   :  { %p3563_p3 = scmp.ne.s32.totalorder %s35_s10, %s3562_s18  ;;  %p3568_p5 = scmp.lt.s32.totalorder %s3562_s18, %s3562_s18 }
   0xe   :  { %p3569_p6 = por %p3568_p5, %p3567_p4 }
  0x10   :  { %p3570_p7 = pnand %p3569_p6, %p3563_p3 }
  0x12   :  { %3573 = shalt.err (!%p3570_p7)
}
  0x13   :  { %s3717_s19 = smov 576   ;;  %s3718_s20 = smov 36  }
  0x14   :  { %40 = dma.hbm_to_vmem [thread:$0]  %s3924_s1, 18432, %s35_s10, [#allocation6], %s3717_s19, %s3717_s19, %s3718_s20  }
  0x15   :  { %s3719_s23 = smov [#allocation8]   ;;  %s3574_s27 = scalar_lea.hbm %s3926_s3, 18432 }
  0x16   :  { %s56_s24 = sshll.u32 %s3719_s23, 4  ;;  %p3575_p8 = scmp.ne.s32.totalorder %s3926_s3, %s3574_s27  ;;  %s57_s24 = int_to_ptr.vmem [resolvable:$true] %s56_s24 }
  0x17   :  { %p3578_p9 = scmp.lt.u32.totalorder %s3574_s27, %s3926_s3 }
  0x19   :  { %p3580_p10 = pnand %p3578_p9, %p3575_p8 }
  0x1b   :  { %3583 = shalt.err (!%p3580_p10)
}
  0x1c   :  { %s3584_s12 = scalar_lea.vmem %s57_s24, 18432  ;;  %p3589_p12 = scmp.lt.s32.totalorder %s57_s24, %s57_s24 }
  0x1d   :  { %p3585_p11 = scmp.ne.s32.totalorder %s57_s24, %s3584_s12  ;;  %p3590_p13 = scmp.lt.s32.totalorder %s3584_s12, %s3584_s12 }
  0x1f   :  { %p3591_p0 = por %p3590_p13, %p3589_p12 }
  0x21   :  { %p3592_p1 = pnand %p3591_p0, %p3585_p11 }
  0x23   :  { %3595 = shalt.err (!%p3592_p1)
}
  0x24   :  { %s3720_s1 = smov 128   ;;  %s3721_s10 = smov 8  }
  0x25   :  { %62 = dma.hbm_to_vmem [thread:$0]  %s3926_s3, 18432, %s57_s24, [#allocation9], %s3720_s1, %s3720_s1, %s3721_s10  }
  0x26   :  { %s3722_s15 = smov [#allocation2]   ;;  %s3723_s17 = smov [#allocation7]  }
  0x27   :  { %s25_s16 = sshll.u32 %s3722_s15, 4  ;;  %s47_s18 = sshll.u32 %s3723_s17, 4  ;;  %s26_s16 = int_to_ptr.vmem [resolvable:$true] %s25_s16  ;;  %s48_s18 = int_to_ptr.vmem [resolvable:$true] %s47_s18 }
  0x28   :  { %s3596_s21 = scalar_lea.hbm %s3923_s0, 128 }
  0x29   :  { %p3597_p2 = scmp.ne.s32.totalorder %s3923_s0, %s3596_s21  ;;  %p3600_p3 = scmp.lt.u32.totalorder %s3596_s21, %s3923_s0 }
  0x2b   :  { %p3602_p4 = pnand %p3600_p3, %p3597_p2 }
  0x2d   :  { %3605 = shalt.err (!%p3602_p4)
}
  0x2e   :  { %s3606_s3 = scalar_lea.vmem %s26_s16, 128  ;;  %p3611_p6 = scmp.lt.s32.totalorder %s26_s16, %s26_s16 }
  0x2f   :  { %p3607_p5 = scmp.ne.s32.totalorder %s26_s16, %s3606_s3  ;;  %p3612_p7 = scmp.lt.s32.totalorder %s3606_s3, %s3606_s3 }
  0x31   :  { %p3613_p8 = por %p3612_p7, %p3611_p6 }
  0x33   :  { %p3614_p9 = pnand %p3613_p8, %p3607_p5 }
  0x35   :  { %3617 = shalt.err (!%p3614_p9)
}
  0x36   :  { %28 = dma.hbm_to_vmem [thread:$0]  %s3923_s0, 128, %s26_s16, [#allocation3]  }
  0x37   :  { %s3618_s30 = scalar_lea.hbm %s3925_s2, 144 }
  0x38   :  { %p3619_p10 = scmp.ne.s32.totalorder %s3925_s2, %s3618_s30  ;;  %p3622_p11 = scmp.lt.u32.totalorder %s3618_s30, %s3925_s2 }
  0x3a   :  { %p3624_p12 = pnand %p3622_p11, %p3619_p10 }
  0x3c   :  { %3627 = shalt.err (!%p3624_p12)
}
  0x3d   :  { %s3628_s13 = scalar_lea.vmem %s48_s18, 144  ;;  %s3632_s14 = scalar_lea.vmem %s48_s18, 160 }
  0x3e   :  { %p3629_p13 = scmp.ne.s32.totalorder %s48_s18, %s3628_s13  ;;  %p3633_p0 = scmp.lt.s32.totalorder %s48_s18, %s48_s18 }
  0x3f   :  { %p3634_p1 = scmp.lt.s32.totalorder %s3632_s14, %s3628_s13 }
  0x41   :  { %p3635_p2 = por %p3634_p1, %p3633_p0 }
  0x43   :  { %p3636_p3 = pnand %p3635_p2, %p3629_p13 }
  0x45   :  { %3639 = shalt.err (!%p3636_p3)
}
  0x46   :  { %50 = dma.hbm_to_vmem [thread:$0]  %s3925_s2, 144, %s48_s18, [#allocation6]  }
  0x47   :  { %s3724_s16 = smov [#allocation10]   ;;  %s3640_s21 = scalar_lea.hbm %s3928_s5, 2048 }
  0x48   :  { %s70_s17 = sshll.u32 %s3724_s16, 4  ;;  %p3641_p4 = scmp.ne.s32.totalorder %s3928_s5, %s3640_s21  ;;  %s71_s17 = int_to_ptr.vmem [resolvable:$true] %s70_s17 }
  0x49   :  { %p3644_p5 = scmp.lt.u32.totalorder %s3640_s21, %s3928_s5 }
  0x4b   :  { %p3646_p6 = pnand %p3644_p5, %p3641_p4 }
  0x4d   :  { %3649 = shalt.err (!%p3646_p6)
}
  0x4e   :  { %s3650_s3 = scalar_lea.vmem %s71_s17, 2048  ;;  %p3655_p8 = scmp.lt.s32.totalorder %s71_s17, %s71_s17 }
  0x4f   :  { %p3651_p7 = scmp.ne.s32.totalorder %s71_s17, %s3650_s3  ;;  %p3656_p9 = scmp.lt.s32.totalorder %s3650_s3, %s3650_s3 }
  0x51   :  { %p3657_p10 = por %p3656_p9, %p3655_p8 }
  0x53   :  { %p3658_p11 = pnand %p3657_p10, %p3651_p7 }
  0x55   :  { %3661 = shalt.err (!%p3658_p11)
}
  0x56   :  { %s3725_s2 = smov 64   ;;  %s3726_s18 = smov 4  }
  0x57   :  { %76 = dma.hbm_to_vmem [thread:$0]  %s3928_s5, 2048, %s71_s17, [#allocation9], %s3725_s2, %s3725_s2, %s3726_s18  }
  0x58   :  { %s3727_s28 = smov [#allocation11]   ;;  %s3662_s12 = scalar_lea.hbm %s3930_s7, 1024 }
  0x59   :  { %s84_s29 = sshll.u32 %s3727_s28, 4  ;;  %p3663_p12 = scmp.ne.s32.totalorder %s3930_s7, %s3662_s12  ;;  %s85_s29 = int_to_ptr.vmem [resolvable:$true] %s84_s29 }
  0x5a   :  { %p3666_p13 = scmp.lt.u32.totalorder %s3662_s12, %s3930_s7 }
  0x5c   :  { %p3668_p0 = pnand %p3666_p13, %p3663_p12 }
  0x5e   :  { %3671 = shalt.err (!%p3668_p0)
}
  0x5f   :  { %s3672_s0 = scalar_lea.vmem %s85_s29, 1024  ;;  %p3677_p2 = scmp.lt.s32.totalorder %s85_s29, %s85_s29 }
  0x60   :  { %p3673_p1 = scmp.ne.s32.totalorder %s85_s29, %s3672_s0  ;;  %p3678_p3 = scmp.lt.s32.totalorder %s3672_s0, %s3672_s0 }
  0x62   :  { %p3679_p4 = por %p3678_p3, %p3677_p2 }
  0x64   :  { %p3680_p5 = pnand %p3679_p4, %p3673_p1 }
  0x66   :  { %3683 = shalt.err (!%p3680_p5)
}
  0x67   :  { %90 = dma.hbm_to_vmem [thread:$0]  %s3930_s7, 1024, %s85_s29, [#allocation12], %s3725_s2, %s3725_s2, %s3726_s18  }
  0x68   :  { %3706 = dma.done.wait [#allocation3], 128  }
  0x69   :  { %3707 = vsyncadd [#allocation3], 4294967168 }
  0x6a   :  { %3708 = dma.done.wait [#allocation6], 18576  }
  0x6b   :  { %3709 = vsyncadd [#allocation6], 4294948720 }
  0x6c   :  { %3710 = dma.done.wait [#allocation9], 20480  }
  0x6d   :  { %3711 = vsyncadd [#allocation9], 4294946816 }
  0x6e   :  { %3712 = dma.done.wait [#allocation12], 1024  }
  0x6f   :  { %3713 = vsyncadd [#allocation12], 4294966272  ;;  %v3102_v0 = vld [vmem:[#allocation5 + $0x4] ss:$36 sps:$4 sm:$0xff]   ;;  %v3105_v2 = vld [vmem:[#allocation5 + $0x4c] ss:$36 sps:$4 sm:$0xff]  }
  0x70   :  { %v3104_v1 = vld [vmem:[#allocation5] ss:$36 sps:$4 sm:$0xff]   ;;  %1065 = vmatprep.subr.bf16.mxu0 %v3102_v0  ;;  %v3107_v3 = vld [vmem:[#allocation5 + $0x48] ss:$36 sps:$4 sm:$0xff]   ;;  %v3108_v4 = vld [vmem:[#allocation5 + $0x94] ss:$36 sps:$4 sm:$0xff]  }
  0x71   :  { %1066 = vmatpush1.bf16.msra.mxu0 %v3104_v1  ;;  %v3110_v5 = vld [vmem:[#allocation5 + $0x90] ss:$36 sps:$4 sm:$0xff]   ;;  %v3111_v6 = vld [vmem:[#allocation5 + $0xdc] ss:$36 sps:$4 sm:$0xff]   ;;  %v3114_v8 = vld [vmem:[#allocation5 + $0x124] ss:$36 sps:$4 sm:$0xff]  }
  0x72   :  { %1067 = vmatprep.subr.bf16.mxu0 %v3105_v2  ;;  %v3113_v7 = vld [vmem:[#allocation5 + $0xd8] ss:$36 sps:$4 sm:$0xff]   ;;  %v3116_v9 = vld [vmem:[#allocation5 + $0x120] ss:$36 sps:$4 sm:$0xff]   ;;  %v3117_v10 = vld [vmem:[#allocation5 + $0x16c] ss:$36 sps:$4 sm:$0xff]  }
  0x73   :  { %v3119_v11 = vld [vmem:[#allocation5 + $0x168] ss:$36 sps:$4 sm:$0xff]   ;;  %v3120_v12 = vld [vmem:[#allocation5 + $0x1b4] ss:$36 sps:$4 sm:$0xff]   ;;  %v3123_v16 = vld [vmem:[#allocation5 + $0x1fc] ss:$36 sps:$4 sm:$0xff]  }
  0x74   :  { %v112_v13 = vld [vmem:[#allocation2] sm:$0xff]  ;;  %v3122_v15 = vld [vmem:[#allocation5 + $0x1b0] ss:$36 sps:$4 sm:$0xff]   ;;  %v3126_v18 = vld [vmem:[#allocation5 + $0x244] ss:$36 sps:$4 sm:$0xff]   ;;  %vm3730_vm0 = vmmov 0  }
  0x75   :  { %1068 = vmatpush1.bf16.msra.mxu0 %v3107_v3  ;;  %v3854_v14 = vcombine.high %v112_v13, %v112_v13  ;;  %v3125_v17 = vld [vmem:[#allocation5 + $0x1f8] ss:$36 sps:$4 sm:$0xff]   ;;  %v3128_v19 = vld [vmem:[#allocation5 + $0x240] ss:$36 sps:$4 sm:$0xff]   ;;  %v3129_v20 = vld [vmem:[#allocation5 + $0x28c] ss:$36 sps:$4 sm:$0xff]   ;;  %v3858_v42 = vcombine.low %v112_v13, %v112_v13 }
  0x76   :  { %1069 = vmatprep.subr.bf16.mxu0 %v3108_v4  ;;  %v3131_v21 = vld [vmem:[#allocation5 + $0x288] ss:$36 sps:$4 sm:$0xff]   ;;  %v3132_v22 = vld [vmem:[#allocation5 + $0x2d4] ss:$36 sps:$4 sm:$0xff]   ;;  %v3135_v24 = vld [vmem:[#allocation5 + $0x31c] ss:$36 sps:$4 sm:$0xff]  }
  0x77   :  { %1097 = vmatprep.mubr.bf16.mxu0 %v3854_v14  ;;  %1220 = vmatprep.mubr.bf16.mxu1 %v3854_v14  ;;  %v3134_v23 = vld [vmem:[#allocation5 + $0x2d0] ss:$36 sps:$4 sm:$0xff]   ;;  %v3137_v25 = vld [vmem:[#allocation5 + $0x318] ss:$36 sps:$4 sm:$0xff]   ;;  %v3138_v26 = vld [vmem:[#allocation5 + $0x364] ss:$36 sps:$4 sm:$0xff]  }
  0x78   :  { %v3140_v27 = vld [vmem:[#allocation5 + $0x360] ss:$36 sps:$4 sm:$0xff]   ;;  %v3141_v28 = vld [vmem:[#allocation5 + $0x3ac] ss:$36 sps:$4 sm:$0xff]   ;;  %v3144_v30 = vld [vmem:[#allocation5 + $0x3f4] ss:$36 sps:$4 sm:$0xff]  }
  0x79   :  { %1070 = vmatpush1.bf16.msra.mxu0 %v3110_v5  ;;  %v3143_v29 = vld [vmem:[#allocation5 + $0x3a8] ss:$36 sps:$4 sm:$0xff]   ;;  %v3221_v31 = vld [vmem:[#allocation5 + $0x1c] ss:$36 sps:$4 sm:$0xff]   ;;  %v3146_v33 = vld [vmem:[#allocation5 + $0x3f0] ss:$36 sps:$4 sm:$0xff]  }
  0x7a   :  { %1071 = vmatprep.subr.bf16.mxu0 %v3111_v6  ;;  %v3223_v32 = vld [vmem:[#allocation5 + $0x18] ss:$36 sps:$4 sm:$0xff]   ;;  %1188 = vmatprep.subr.bf16.mxu1 %v3221_v31  ;;  %v3227_v35 = vld [vmem:[#allocation5 + $0x64] ss:$36 sps:$4 sm:$0xff]   ;;  %v3233_v38 = vld [vmem:[#allocation5 + $0xac] ss:$36 sps:$4 sm:$0xff]  }
  0x7b   :  { %v3147_v34 = vld [vmem:[#allocation5 + $0x43c] ss:$36 sps:$4 sm:$0xff]   ;;  %1189 = vmatpush1.bf16.msra.mxu1 %v3223_v32  ;;  %v3154_v39 = vld [vmem:[#allocation5 + $0xc] ss:$36 sps:$4 sm:$0xff]   ;;  %v3239_v41 = vld [vmem:[#allocation5 + $0xf4] ss:$36 sps:$4 sm:$0xff]  }
  0x7c   :  { %v3229_v36 = vld [vmem:[#allocation5 + $0x60] ss:$36 sps:$4 sm:$0xff]   ;;  %1190 = vmatprep.subr.bf16.mxu1 %v3227_v35  ;;  %v3149_v37 = vld [vmem:[#allocation5 + $0x438] ss:$36 sps:$4 sm:$0xff]   ;;  %v3235_v40 = vld [vmem:[#allocation5 + $0xa8] ss:$36 sps:$4 sm:$0xff]  }
  0x7d   :  { %1072 = vmatpush1.bf16.msra.mxu0 %v3113_v7  ;;  %v3152_v43 = vld [vmem:[#allocation5 + $0x8] ss:$36 sps:$4 sm:$0xff]   ;;  %v3157_v44 = vld [vmem:[#allocation5 + $0x54] ss:$36 sps:$4 sm:$0xff]   ;;  %v3245_v46 = vld [vmem:[#allocation5 + $0x13c] ss:$36 sps:$4 sm:$0xff]  }
  0x7e   :  { %1073 = vmatprep.subr.bf16.mxu0 %v3114_v8  ;;  %v3241_v45 = vld [vmem:[#allocation5 + $0xf0] ss:$36 sps:$4 sm:$0xff]   ;;  %v3160_v48 = vld [vmem:[#allocation5 + $0x9c] ss:$36 sps:$4 sm:$0xff]   ;;  %v3251_v50 = vld [vmem:[#allocation5 + $0x184] ss:$36 sps:$4 sm:$0xff]  }
  0x7f   :  { %1191 = vmatpush1.bf16.msra.mxu1 %v3229_v36  ;;  %v3155_v47 = vld [vmem:[#allocation5 + $0x50] ss:$36 sps:$4 sm:$0xff]   ;;  %v3247_v49 = vld [vmem:[#allocation5 + $0x138] ss:$36 sps:$4 sm:$0xff]   ;;  %v3163_v52 = vld [vmem:[#allocation5 + $0xe4] ss:$36 sps:$4 sm:$0xff]  }
  0x80   :  { %1192 = vmatprep.subr.bf16.mxu1 %v3233_v38  ;;  %v3158_v51 = vld [vmem:[#allocation5 + $0x98] ss:$36 sps:$4 sm:$0xff]   ;;  %v3253_v53 = vld [vmem:[#allocation5 + $0x180] ss:$36 sps:$4 sm:$0xff]   ;;  %v3257_v54 = vld [vmem:[#allocation5 + $0x1cc] ss:$36 sps:$4 sm:$0xff]  }
  0x81   :  { %1074 = vmatpush1.bf16.msra.mxu0 %v3116_v9  ;;  %v3161_v55 = vld [vmem:[#allocation5 + $0xe0] ss:$36 sps:$4 sm:$0xff]   ;;  %v3166_v56 = vld [vmem:[#allocation5 + $0x12c] ss:$36 sps:$4 sm:$0xff]   ;;  %v3263_v58 = vld [vmem:[#allocation5 + $0x214] ss:$36 sps:$4 sm:$0xff]  }
  0x82   :  { %1075 = vmatprep.subr.bf16.mxu0 %v3117_v10  ;;  %v3259_v57 = vld [vmem:[#allocation5 + $0x1c8] ss:$36 sps:$4 sm:$0xff]   ;;  %v3169_v60 = vld [vmem:[#allocation5 + $0x174] ss:$36 sps:$4 sm:$0xff]   ;;  %v3269_v62 = vld [vmem:[#allocation5 + $0x25c] ss:$36 sps:$4 sm:$0xff]  }
  0x83   :  { %1193 = vmatpush1.bf16.msra.mxu1 %v3235_v40  ;;  %v3164_v59 = vld [vmem:[#allocation5 + $0x128] ss:$36 sps:$4 sm:$0xff]   ;;  %v3265_v61 = vld [vmem:[#allocation5 + $0x210] ss:$36 sps:$4 sm:$0xff]   ;;  %v3172_v0 = vld [vmem:[#allocation5 + $0x1bc] ss:$36 sps:$4 sm:$0xff]  }
  0x84   :  { %1194 = vmatprep.subr.bf16.mxu1 %v3239_v41  ;;  %v3167_v63 = vld [vmem:[#allocation5 + $0x170] ss:$36 sps:$4 sm:$0xff]   ;;  %v3271_v1 = vld [vmem:[#allocation5 + $0x258] ss:$36 sps:$4 sm:$0xff]   ;;  %v3275_v2 = vld [vmem:[#allocation5 + $0x2a4] ss:$36 sps:$4 sm:$0xff]  }
  0x85   :  { %1076 = vmatpush1.bf16.msra.mxu0 %v3119_v11  ;;  %v3170_v3 = vld [vmem:[#allocation5 + $0x1b8] ss:$36 sps:$4 sm:$0xff]   ;;  %v3175_v4 = vld [vmem:[#allocation5 + $0x204] ss:$36 sps:$4 sm:$0xff]   ;;  %v3278_v6 = vld [vmem:[#allocation5 + $0x2ec] ss:$36 sps:$4 sm:$0xff]  }
  0x86   :  { %1077 = vmatprep.subr.bf16.mxu0 %v3120_v12  ;;  %v3277_v5 = vld [vmem:[#allocation5 + $0x2a0] ss:$36 sps:$4 sm:$0xff]   ;;  %v3178_v8 = vld [vmem:[#allocation5 + $0x24c] ss:$36 sps:$4 sm:$0xff]   ;;  %v3281_v10 = vld [vmem:[#allocation5 + $0x334] ss:$36 sps:$4 sm:$0xff]  }
  0x87   :  { %1195 = vmatpush1.bf16.msra.mxu1 %v3241_v45  ;;  %v3173_v7 = vld [vmem:[#allocation5 + $0x200] ss:$36 sps:$4 sm:$0xff]   ;;  %v3280_v9 = vld [vmem:[#allocation5 + $0x2e8] ss:$36 sps:$4 sm:$0xff]   ;;  %v3181_v12 = vld [vmem:[#allocation5 + $0x294] ss:$36 sps:$4 sm:$0xff]  }
  0x88   :  { %1196 = vmatprep.subr.bf16.mxu1 %v3245_v46  ;;  %v3176_v11 = vld [vmem:[#allocation5 + $0x248] ss:$36 sps:$4 sm:$0xff]   ;;  %v3283_v13 = vld [vmem:[#allocation5 + $0x330] ss:$36 sps:$4 sm:$0xff]   ;;  %v3194_v36 = vld [vmem:[#allocation5 + $0x3f8] ss:$36 sps:$4 sm:$0xff]  }
  0x89   :  { %1078 = vmatpush1.bf16.msra.mxu0 %v3122_v15  ;;  %v3284_v15 = vld [vmem:[#allocation5 + $0x37c] ss:$36 sps:$4 sm:$0xff]   ;;  %v3298_v31 = vld [vmem:[#allocation8 + $0x4] ss:$8 sps:$4 sm:$0xff]   ;;  %s3731_s21 = smov [#allocation13]  }
  0x8a   :  { %1079 = vmatprep.subr.bf16.mxu0 %v3123_v16  ;;  %v3179_v16 = vld [vmem:[#allocation5 + $0x290] ss:$36 sps:$4 sm:$0xff]   ;;  %v3303_v35 = vld [vmem:[#allocation8 + $0x14] ss:$8 sps:$4 sm:$0xff]   ;;  %v3301_v38 = vld [vmem:[#allocation8 + $0x10] ss:$8 sps:$4 sm:$0xff]  }
  0x8b   :  { %1197 = vmatpush1.bf16.msra.mxu1 %v3247_v49  ;;  %v3191_v32 = vld [vmem:[#allocation5 + $0x3b0] ss:$36 sps:$4 sm:$0xff]   ;;  %v3197_v40 = vld [vmem:[#allocation5 + $0x440] ss:$36 sps:$4 sm:$0xff]   ;;  %v3203_v49 = vld [vmem:[#allocation5 + $0x58] ss:$36 sps:$4 sm:$0xff]  }
  0x8c   :  { %1198 = vmatprep.subr.bf16.mxu1 %v3251_v50  ;;  %v3202_v41 = vld [vmem:[#allocation5 + $0x14] ss:$36 sps:$4 sm:$0xff]   ;;  %v3205_v46 = vld [vmem:[#allocation5 + $0x5c] ss:$36 sps:$4 sm:$0xff]   ;;  %v3208_v50 = vld [vmem:[#allocation5 + $0xa4] ss:$36 sps:$4 sm:$0xff]  }
  0x8d   :  { %1080 = vmatpush1.bf16.msra.mxu0 %v3125_v17  ;;  %v3184_v17 = vld [vmem:[#allocation5 + $0x2dc] ss:$36 sps:$4 sm:$0xff]   ;;  %v3200_v45 = vld [vmem:[#allocation5 + $0x10] ss:$36 sps:$4 sm:$0xff]   ;;  %s2668_s22 = sshll.u32 %s3731_s21, 4  ;;  %s2669_s22 = int_to_ptr.vmem [resolvable:$true] %s2668_s22 }
  0x8e   :  { %1081 = vmatprep.subr.bf16.mxu0 %v3126_v18  ;;  %v3286_v18 = vld [vmem:[#allocation5 + $0x378] ss:$36 sps:$4 sm:$0xff]   ;;  %p3689_p7 = scmp.lt.s32.totalorder %s2669_s22, %s2669_s22 }
  0x8f   :  { %1199 = vmatpush1.bf16.msra.mxu1 %v3253_v53  ;;  %v3206_v53 = vld [vmem:[#allocation5 + $0xa0] ss:$36 sps:$4 sm:$0xff]  }
  0x90   :  { %1200 = vmatprep.subr.bf16.mxu1 %v3257_v54  ;;  %v3211_v54 = vld [vmem:[#allocation5 + $0xec] ss:$36 sps:$4 sm:$0xff]  }
  0x91   :  { %1082 = vmatpush1.bf16.msra.mxu0 %v3128_v19  ;;  %v3287_v19 = vld [vmem:[#allocation5 + $0x3c4] ss:$36 sps:$4 sm:$0xff]  }
  0x92   :  { %1083 = vmatprep.subr.bf16.mxu0 %v3129_v20  ;;  %v3182_v20 = vld [vmem:[#allocation5 + $0x2d8] ss:$36 sps:$4 sm:$0xff]  }
  0x93   :  { %1201 = vmatpush1.bf16.msra.mxu1 %v3259_v57  ;;  %v3209_v57 = vld [vmem:[#allocation5 + $0xe8] ss:$36 sps:$4 sm:$0xff]  }
  0x94   :  { %1202 = vmatprep.subr.bf16.mxu1 %v3263_v58  ;;  %v3214_v58 = vld [vmem:[#allocation5 + $0x134] ss:$36 sps:$4 sm:$0xff]  }
  0x95   :  { %1084 = vmatpush1.bf16.msra.mxu0 %v3131_v21  ;;  %v3187_v21 = vld [vmem:[#allocation5 + $0x324] ss:$36 sps:$4 sm:$0xff]  }
  0x96   :  { %1085 = vmatprep.subr.bf16.mxu0 %v3132_v22  ;;  %v3289_v22 = vld [vmem:[#allocation5 + $0x3c0] ss:$36 sps:$4 sm:$0xff]  }
  0x97   :  { %1203 = vmatpush1.bf16.msra.mxu1 %v3265_v61  ;;  %v3212_v61 = vld [vmem:[#allocation5 + $0x130] ss:$36 sps:$4 sm:$0xff]  }
  0x98   :  { %1204 = vmatprep.subr.bf16.mxu1 %v3269_v62  ;;  %v3217_v62 = vld [vmem:[#allocation5 + $0x17c] ss:$36 sps:$4 sm:$0xff]  }
  0x99   :  { %1086 = vmatpush1.bf16.msra.mxu0 %v3134_v23  ;;  %v3290_v23 = vld [vmem:[#allocation5 + $0x40c] ss:$36 sps:$4 sm:$0xff]  }
  0x9a   :  { %1087 = vmatprep.subr.bf16.mxu0 %v3135_v24  ;;  %v3185_v24 = vld [vmem:[#allocation5 + $0x320] ss:$36 sps:$4 sm:$0xff]  }
  0x9b   :  { %1205 = vmatpush1.bf16.msra.mxu1 %v3271_v1  ;;  %v3215_v1 = vld [vmem:[#allocation5 + $0x178] ss:$36 sps:$4 sm:$0xff]  }
  0x9c   :  { %1206 = vmatprep.subr.bf16.mxu1 %v3275_v2  ;;  %v3220_v2 = vld [vmem:[#allocation5 + $0x1c4] ss:$36 sps:$4 sm:$0xff]  }
  0x9d   :  { %1088 = vmatpush1.bf16.msra.mxu0 %v3137_v25  ;;  %v3190_v25 = vld [vmem:[#allocation5 + $0x36c] ss:$36 sps:$4 sm:$0xff]  }
  0x9e   :  { %1089 = vmatprep.subr.bf16.mxu0 %v3138_v26  ;;  %v3292_v26 = vld [vmem:[#allocation5 + $0x408] ss:$36 sps:$4 sm:$0xff]  }
  0x9f   :  { %1207 = vmatpush1.bf16.msra.mxu1 %v3277_v5  ;;  %v3218_v5 = vld [vmem:[#allocation5 + $0x1c0] ss:$36 sps:$4 sm:$0xff]  }
  0xa0   :  { %1208 = vmatprep.subr.bf16.mxu1 %v3278_v6  ;;  %v3226_v6 = vld [vmem:[#allocation5 + $0x20c] ss:$36 sps:$4 sm:$0xff]  }
  0xa1   :  { %1090 = vmatpush1.bf16.msra.mxu0 %v3140_v27  ;;  %v3293_v27 = vld [vmem:[#allocation5 + $0x454] ss:$36 sps:$4 sm:$0xff]  }
  0xa2   :  { %1091 = vmatprep.subr.bf16.mxu0 %v3141_v28  ;;  %v3188_v28 = vld [vmem:[#allocation5 + $0x368] ss:$36 sps:$4 sm:$0xff]  }
  0xa3   :  { %1209 = vmatpush1.bf16.msra.mxu1 %v3280_v9  ;;  %v3224_v9 = vld [vmem:[#allocation5 + $0x208] ss:$36 sps:$4 sm:$0xff]  }
  0xa4   :  { %1210 = vmatprep.subr.bf16.mxu1 %v3281_v10  ;;  %v3232_v10 = vld [vmem:[#allocation5 + $0x254] ss:$36 sps:$4 sm:$0xff]  }
  0xa5   :  { %1092 = vmatpush1.bf16.msra.mxu0 %v3143_v29  ;;  %v3193_v29 = vld [vmem:[#allocation5 + $0x3b4] ss:$36 sps:$4 sm:$0xff]  }
  0xa6   :  { %1093 = vmatprep.subr.bf16.mxu0 %v3144_v30  ;;  %v3295_v30 = vld [vmem:[#allocation5 + $0x450] ss:$36 sps:$4 sm:$0xff]  }
  0xa7   :  { %1211 = vmatpush1.bf16.msra.mxu1 %v3283_v13  ;;  %v3230_v13 = vld [vmem:[#allocation5 + $0x250] ss:$36 sps:$4 sm:$0xff]  }
  0xa8   :  { %1212 = vmatprep.subr.bf16.mxu1 %v3284_v15  ;;  %v3238_v15 = vld [vmem:[#allocation5 + $0x29c] ss:$36 sps:$4 sm:$0xff]  }
  0xa9   :  { %1094 = vmatpush1.bf16.msra.mxu0 %v3146_v33  ;;  %v3196_v33 = vld [vmem:[#allocation5 + $0x3fc] ss:$36 sps:$4 sm:$0xff]  }
  0xaa   :  { %1095 = vmatprep.subr.bf16.mxu0 %v3147_v34  ;;  %v3296_v34 = vld [vmem:[#allocation8] ss:$8 sps:$4 sm:$0xff]  }
  0xab   :  { %1213 = vmatpush1.bf16.msra.mxu1 %v3286_v18  ;;  %v3236_v18 = vld [vmem:[#allocation5 + $0x298] ss:$36 sps:$4 sm:$0xff]  }
  0xac   :  { %1214 = vmatprep.subr.bf16.mxu1 %v3287_v19  ;;  %v3244_v19 = vld [vmem:[#allocation5 + $0x2e4] ss:$36 sps:$4 sm:$0xff]  }
  0xad   :  { %1096 = vmatpush1.bf16.msra.mxu0 %v3149_v37  ;;  %v3199_v37 = vld [vmem:[#allocation5 + $0x444] ss:$36 sps:$4 sm:$0xff]  }
  0xae   :  { %1106 = vmatprep.subr.bf16.mxu0 %v3154_v39  ;;  %v3308_v39 = vld [vmem:[#allocation8 + $0x24] ss:$8 sps:$4 sm:$0xff]  }
  0xaf   :  { %1215 = vmatpush1.bf16.msra.mxu1 %v3289_v22  ;;  %v3242_v22 = vld [vmem:[#allocation5 + $0x2e0] ss:$36 sps:$4 sm:$0xff]  }
  0xb0   :  { %1098 = vmatmul.mubr.bf16.vlgmr.msra.gmra.mrb[0].mxu0 %v3858_v42  ;;  %1216 = vmatprep.subr.bf16.mxu1 %v3290_v23  ;;  %v3250_v23 = vld [vmem:[#allocation5 + $0x32c] ss:$36 sps:$4 sm:$0xff]  }
  0xb1   :  { %1107 = vmatpush1.bf16.msra.mxu0 %v3152_v43  ;;  %1138 = vmatprep.mubr.bf16.mxu0 %v3854_v14  ;;  %v3306_v43 = vld [vmem:[#allocation8 + $0x20] ss:$8 sps:$4 sm:$0xff]  }
  0xb2   :  { %1108 = vmatprep.subr.bf16.mxu0 %v3157_v44  ;;  %v3313_v44 = vld [vmem:[#allocation8 + $0x34] ss:$8 sps:$4 sm:$0xff]  }
  0xb3   :  { %1217 = vmatpush1.bf16.msra.mxu1 %v3292_v26  ;;  %v3248_v26 = vld [vmem:[#allocation5 + $0x328] ss:$36 sps:$4 sm:$0xff]  }
  0xb4   :  { %1218 = vmatprep.subr.bf16.mxu1 %v3293_v27  ;;  %v3256_v27 = vld [vmem:[#allocation5 + $0x374] ss:$36 sps:$4 sm:$0xff]  }
  0xb5   :  { %1109 = vmatpush1.bf16.msra.mxu0 %v3155_v47  ;;  %v3311_v47 = vld [vmem:[#allocation8 + $0x30] ss:$8 sps:$4 sm:$0xff]  }
  0xb6   :  { %1110 = vmatprep.subr.bf16.mxu0 %v3160_v48  ;;  %v3318_v48 = vld [vmem:[#allocation8 + $0x44] ss:$8 sps:$4 sm:$0xff]  }
  0xb7   :  { %1219 = vmatpush1.bf16.msra.mxu1 %v3295_v30  ;;  %v3254_v30 = vld [vmem:[#allocation5 + $0x370] ss:$36 sps:$4 sm:$0xff]  }
  0xb8   :  { %2163 = vmatprep.subr.bf16.mxu1 %v3298_v31  ;;  %v3262_v31 = vld [vmem:[#allocation5 + $0x3bc] ss:$36 sps:$4 sm:$0xff]  }
  0xb9   :  { %1111 = vmatpush1.bf16.msra.mxu0 %v3158_v51  ;;  %v3316_v51 = vld [vmem:[#allocation8 + $0x40] ss:$8 sps:$4 sm:$0xff]  }
  0xba   :  { %1112 = vmatprep.subr.bf16.mxu0 %v3163_v52  ;;  %1221 = vmatmul.mubr.bf16.vlgmr.msra.gmra.mrb[0].mxu1 %v3858_v42  ;;  %v3323_v52 = vld [vmem:[#allocation8 + $0x54] ss:$8 sps:$4 sm:$0xff]  }
  0xbb   :  { %2164 = vmatpush1.bf16.msra.mxu1 %v3296_v34  ;;  %v3260_v34 = vld [vmem:[#allocation5 + $0x3b8] ss:$36 sps:$4 sm:$0xff]  }
  0xbc   :  { %2165 = vmatprep.subr.bf16.mxu1 %v3303_v35  ;;  %v3268_v35 = vld [vmem:[#allocation5 + $0x404] ss:$36 sps:$4 sm:$0xff]  }
  0xbd   :  { %1113 = vmatpush1.bf16.msra.mxu0 %v3161_v55  ;;  %v3321_v55 = vld [vmem:[#allocation8 + $0x50] ss:$8 sps:$4 sm:$0xff]  }
  0xbe   :  { %1114 = vmatprep.subr.bf16.mxu0 %v3166_v56  ;;  %v3328_v56 = vld [vmem:[#allocation8 + $0x64] ss:$8 sps:$4 sm:$0xff]  }
  0xbf   :  { %2166 = vmatpush1.bf16.msra.mxu1 %v3301_v38  ;;  %v3272_v38 = vld [vmem:[#allocation5 + $0x448] ss:$36 sps:$4 sm:$0xff]  }
  0xc0   :  { %2167 = vmatprep.subr.bf16.mxu1 %v3308_v39  ;;  %v3299_v39 = vld [vmem:[#allocation5 + $0x260] ss:$36 sps:$4 sm:$0xff]  }
  0xc1   :  { %1115 = vmatpush1.bf16.msra.mxu0 %v3164_v59  ;;  %v3326_v59 = vld [vmem:[#allocation8 + $0x60] ss:$8 sps:$4 sm:$0xff]  }
  0xc2   :  { %1116 = vmatprep.subr.bf16.mxu0 %v3169_v60  ;;  %v3333_v60 = vld [vmem:[#allocation8 + $0x74] ss:$8 sps:$4 sm:$0xff]  }
  0xc3   :  { %2168 = vmatpush1.bf16.msra.mxu1 %v3306_v43  ;;  %v3305_v43 = vld [vmem:[#allocation5 + $0x68] ss:$36 sps:$4 sm:$0xff]  }
  0xc4   :  { %2169 = vmatprep.subr.bf16.mxu1 %v3313_v44  ;;  %v3309_v44 = vld [vmem:[#allocation5 + $0x2f0] ss:$36 sps:$4 sm:$0xff]  }
  0xc5   :  { %1117 = vmatpush1.bf16.msra.mxu0 %v3167_v63  ;;  %v3331_v63 = vld [vmem:[#allocation8 + $0x70] ss:$8 sps:$4 sm:$0xff]  }
  0xc6   :  { %1118 = vmatprep.subr.bf16.mxu0 %v3172_v0  ;;  %v3338_v0 = vld [vmem:[#allocation8 + $0x84] ss:$8 sps:$4 sm:$0xff]  }
  0xc7   :  { %2170 = vmatpush1.bf16.msra.mxu1 %v3311_v47  ;;  %v3315_v47 = vld [vmem:[#allocation5 + $0xf8] ss:$36 sps:$4 sm:$0xff]  }
  0xc8   :  { %2171 = vmatprep.subr.bf16.mxu1 %v3318_v48  ;;  %v3319_v48 = vld [vmem:[#allocation5 + $0x380] ss:$36 sps:$4 sm:$0xff]  }
  0xc9   :  { %1119 = vmatpush1.bf16.msra.mxu0 %v3170_v3  ;;  %v3336_v3 = vld [vmem:[#allocation8 + $0x80] ss:$8 sps:$4 sm:$0xff]  }
  0xca   :  { %1120 = vmatprep.subr.bf16.mxu0 %v3175_v4  ;;  %v3341_v4 = vld [vmem:[#allocation8 + $0x94] ss:$8 sps:$4 sm:$0xff]  }
  0xcb   :  { %2172 = vmatpush1.bf16.msra.mxu1 %v3316_v51  ;;  %v3325_v51 = vld [vmem:[#allocation5 + $0x188] ss:$36 sps:$4 sm:$0xff]  }
  0xcc   :  { %2173 = vmatprep.subr.bf16.mxu1 %v3323_v52  ;;  %v3329_v52 = vld [vmem:[#allocation5 + $0x410] ss:$36 sps:$4 sm:$0xff]  }
  0xcd   :  { %1121 = vmatpush1.bf16.msra.mxu0 %v3173_v7  ;;  %v3339_v7 = vld [vmem:[#allocation8 + $0x90] ss:$8 sps:$4 sm:$0xff]  }
  0xce   :  { %1122 = vmatprep.subr.bf16.mxu0 %v3178_v8  ;;  %v3344_v8 = vld [vmem:[#allocation8 + $0xa4] ss:$8 sps:$4 sm:$0xff]  }
  0xcf   :  { %2174 = vmatpush1.bf16.msra.mxu1 %v3321_v55  ;;  %v277_v55 = vlaneseq }
  0xd0   :  { %2175 = vmatprep.subr.bf16.mxu1 %v3328_v56 }
  0xd1   :  { %1123 = vmatpush1.bf16.msra.mxu0 %v3176_v11  ;;  %v3342_v11 = vld [vmem:[#allocation8 + $0xa0] ss:$8 sps:$4 sm:$0xff]   ;;  %v3868_v56 = vshrl.u32 %v277_v55, 7  ;;  %v3518_v55 = vld [vmem:[#allocation8 + $0x464] ss:$8 sps:$4 sm:$0xff]  }
  0xd2   :  { %1124 = vmatprep.subr.bf16.mxu0 %v3181_v12  ;;  %v3347_v12 = vld [vmem:[#allocation8 + $0xb4] ss:$8 sps:$4 sm:$0xff]  }
  0xd3   :  { %2176 = vmatpush1.bf16.msra.mxu1 %v3326_v59  ;;  %v283_v59 = vsub.s32 1, %v3868_v56 }
  0xd4   :  { %2177 = vmatprep.subr.bf16.mxu1 %v3333_v60 }
  0xd5   :  { %1125 = vmatpush1.bf16.msra.mxu0 %v3179_v16  ;;  %v3345_v16 = vld [vmem:[#allocation8 + $0xb0] ss:$8 sps:$4 sm:$0xff]  }
  0xd6   :  { %1126 = vmatprep.subr.bf16.mxu0 %v3184_v17  ;;  %v3350_v17 = vld [vmem:[#allocation8 + $0xc4] ss:$8 sps:$4 sm:$0xff]  }
  0xd7   :  { %2178 = vmatpush1.bf16.msra.mxu1 %v3331_v63 }
  0xd8   :  { %2179 = vmatprep.subr.bf16.mxu1 %v3338_v0 }
  0xd9   :  { %1127 = vmatpush1.bf16.msra.mxu0 %v3182_v20  ;;  %v3348_v20 = vld [vmem:[#allocation8 + $0xc0] ss:$8 sps:$4 sm:$0xff]  }
  0xda   :  { %1128 = vmatprep.subr.bf16.mxu0 %v3187_v21  ;;  %v3353_v21 = vld [vmem:[#allocation8 + $0xd4] ss:$8 sps:$4 sm:$0xff]  }
  0xdb   :  { %2180 = vmatpush1.bf16.msra.mxu1 %v3336_v3 }
  0xdc   :  { %2181 = vmatprep.subr.bf16.mxu1 %v3341_v4 }
  0xdd   :  { %1129 = vmatpush1.bf16.msra.mxu0 %v3185_v24  ;;  %v3351_v24 = vld [vmem:[#allocation8 + $0xd0] ss:$8 sps:$4 sm:$0xff]  }
  0xde   :  { %1130 = vmatprep.subr.bf16.mxu0 %v3190_v25  ;;  %v3356_v25 = vld [vmem:[#allocation8 + $0xe4] ss:$8 sps:$4 sm:$0xff]  }
  0xdf   :  { %2182 = vmatpush1.bf16.msra.mxu1 %v3339_v7 }
  0xe0   :  { %2183 = vmatprep.subr.bf16.mxu1 %v3344_v8  ;;  %v3365_v8 = vld [vmem:[#allocation8 + $0x114] ss:$8 sps:$4 sm:$0xff]  }
  0xe1   :  { %1131 = vmatpush1.bf16.msra.mxu0 %v3188_v28  ;;  %v3354_v28 = vld [vmem:[#allocation8 + $0xe0] ss:$8 sps:$4 sm:$0xff]  }
  0xe2   :  { %1132 = vmatprep.subr.bf16.mxu0 %v3193_v29  ;;  %v3359_v29 = vld [vmem:[#allocation8 + $0xf4] ss:$8 sps:$4 sm:$0xff]  }
  0xe3   :  { %2184 = vmatpush1.bf16.msra.mxu1 %v3342_v11  ;;  %v3366_v11 = vld [vmem:[#allocation8 + $0x120] ss:$8 sps:$4 sm:$0xff]  }
  0xe4   :  { %2185 = vmatprep.subr.bf16.mxu1 %v3347_v12  ;;  %v3371_v12 = vld [vmem:[#allocation8 + $0x134] ss:$8 sps:$4 sm:$0xff]  }
  0xe5   :  { %1133 = vmatpush1.bf16.msra.mxu0 %v3191_v32  ;;  %v3357_v32 = vld [vmem:[#allocation8 + $0xf0] ss:$8 sps:$4 sm:$0xff]  }
  0xe6   :  { %1134 = vmatprep.subr.bf16.mxu0 %v3196_v33  ;;  %v3362_v33 = vld [vmem:[#allocation8 + $0x104] ss:$8 sps:$4 sm:$0xff]  }
  0xe7   :  { %2186 = vmatpush1.bf16.msra.mxu1 %v3345_v16  ;;  %v3372_v16 = vld [vmem:[#allocation8 + $0x140] ss:$8 sps:$4 sm:$0xff]  }
  0xe8   :  { %2187 = vmatprep.subr.bf16.mxu1 %v3350_v17  ;;  %v3377_v17 = vld [vmem:[#allocation8 + $0x154] ss:$8 sps:$4 sm:$0xff]  }
  0xe9   :  { %1135 = vmatpush1.bf16.msra.mxu0 %v3194_v36  ;;  %v3266_v36 = vld [vmem:[#allocation5 + $0x400] ss:$36 sps:$4 sm:$0xff]  }
  0xea   :  { %1136 = vmatprep.subr.bf16.mxu0 %v3199_v37  ;;  %v3274_v37 = vld [vmem:[#allocation5 + $0x44c] ss:$36 sps:$4 sm:$0xff]  }
  0xeb   :  { %2188 = vmatpush1.bf16.msra.mxu1 %v3348_v20  ;;  %v3378_v20 = vld [vmem:[#allocation8 + $0x160] ss:$8 sps:$4 sm:$0xff]  }
  0xec   :  { %2189 = vmatprep.subr.bf16.mxu1 %v3353_v21  ;;  %v3383_v21 = vld [vmem:[#allocation8 + $0x174] ss:$8 sps:$4 sm:$0xff]  }
  0xed   :  { %1137 = vmatpush1.bf16.msra.mxu0 %v3197_v40  ;;  %v3300_v40 = vld [vmem:[#allocation5 + $0x20] ss:$36 sps:$4 sm:$0xff]  }
  0xee   :  { %1147 = vmatprep.subr.bf16.mxu0 %v3202_v41  ;;  %v3304_v41 = vld [vmem:[#allocation5 + $0x2a8] ss:$36 sps:$4 sm:$0xff]  }
  0xef   :  { %2190 = vmatpush1.bf16.msra.mxu1 %v3351_v24  ;;  %v3482_v24 = vld [vmem:[#allocation8 + $0x404] ss:$8 sps:$4 sm:$0xff]  }
  0xf0   :  { %1139 = vmatmul.mubr.bf16.vlgmr.msra.gmra.mrb[4].mxu0 %v3858_v42  ;;  %2191 = vmatprep.subr.bf16.mxu1 %v3356_v25  ;;  %v3384_v25 = vld [vmem:[#allocation8 + $0x180] ss:$8 sps:$4 sm:$0xff]  }
  0xf1   :  { %1148 = vmatpush1.bf16.msra.mxu0 %v3200_v45  ;;  %1179 = vmatprep.mubr.bf16.mxu0 %v3854_v14  ;;  %v3310_v45 = vld [vmem:[#allocation5 + $0xb0] ss:$36 sps:$4 sm:$0xff]  }
  0xf2   :  { %1149 = vmatprep.subr.bf16.mxu0 %v3205_v46  ;;  %v3314_v46 = vld [vmem:[#allocation5 + $0x338] ss:$36 sps:$4 sm:$0xff]  }
  0xf3   :  { %2192 = vmatpush1.bf16.msra.mxu1 %v3354_v28  ;;  %v3488_v28 = vld [vmem:[#allocation8 + $0x414] ss:$8 sps:$4 sm:$0xff]  }
  0xf4   :  { %2193 = vmatprep.subr.bf16.mxu1 %v3359_v29  ;;  %v3387_v29 = vld [vmem:[#allocation8 + $0x190] ss:$8 sps:$4 sm:$0xff]  }
  0xf5   :  { %1150 = vmatpush1.bf16.msra.mxu0 %v3203_v49  ;;  %v3320_v49 = vld [vmem:[#allocation5 + $0x140] ss:$36 sps:$4 sm:$0xff]  }
  0xf6   :  { %1151 = vmatprep.subr.bf16.mxu0 %v3208_v50  ;;  %v3324_v50 = vld [vmem:[#allocation5 + $0x3c8] ss:$36 sps:$4 sm:$0xff]  }
  0xf7   :  { %2194 = vmatpush1.bf16.msra.mxu1 %v3357_v32  ;;  %v3494_v32 = vld [vmem:[#allocation8 + $0x424] ss:$8 sps:$4 sm:$0xff]  }
  0xf8   :  { %2204 = vmatprep.subr.bf16.mxu1 %v3362_v33  ;;  %v3390_v33 = vld [vmem:[#allocation8 + $0x1a0] ss:$8 sps:$4 sm:$0xff]  }
  0xf9   :  { %1152 = vmatpush1.bf16.msra.mxu0 %v3206_v53  ;;  %v3334_v53 = vld [vmem:[#allocation5 + $0x458] ss:$36 sps:$4 sm:$0xff]  }
  0xfa   :  { %1153 = vmatprep.subr.bf16.mxu0 %v3211_v54  ;;  %v3335_v54 = vld [vmem:[#allocation5 + $0x218] ss:$36 sps:$4 sm:$0xff]  }
  0xfd   :  { %1154 = vmatpush1.bf16.msra.mxu0 %v3209_v57  ;;  %v279_v57 = vsub.s32 0, %v3868_v56 }
  0xfe   :  { %1155 = vmatprep.subr.bf16.mxu0 %v3214_v58  ;;  %v3871_v58 = vld [vmem:[#allocation7] sm:$0xff] }
  0xff   :  { %v280_v60 = vrot.slane %v3871_v58, %v279_v57 }
 0x101   :  { %1156 = vmatpush1.bf16.msra.mxu0 %v3212_v61  ;;  %v284_v61 = vrot.slane %v3871_v58, %v283_v59 }
 0x102   :  { %1157 = vmatprep.subr.bf16.mxu0 %v3217_v62 }
 0x105   :  { %1158 = vmatpush1.bf16.msra.mxu0 %v3215_v1 }
 0x106   :  { %1159 = vmatprep.subr.bf16.mxu0 %v3220_v2 }
 0x109   :  { %1160 = vmatpush1.bf16.msra.mxu0 %v3218_v5 }
 0x10a   :  { %1161 = vmatprep.subr.bf16.mxu0 %v3226_v6  ;;  %v3360_v6 = vld [vmem:[#allocation8 + $0x100] ss:$8 sps:$4 sm:$0xff]  }
 0x10d   :  { %1162 = vmatpush1.bf16.msra.mxu0 %v3224_v9  ;;  %v3363_v9 = vld [vmem:[#allocation8 + $0x110] ss:$8 sps:$4 sm:$0xff]  }
 0x10e   :  { %1163 = vmatprep.subr.bf16.mxu0 %v3232_v10  ;;  %v3368_v10 = vld [vmem:[#allocation8 + $0x124] ss:$8 sps:$4 sm:$0xff]  }
 0x111   :  { %1164 = vmatpush1.bf16.msra.mxu0 %v3230_v13  ;;  %v3369_v13 = vld [vmem:[#allocation8 + $0x130] ss:$8 sps:$4 sm:$0xff]  }
 0x112   :  { %1165 = vmatprep.subr.bf16.mxu0 %v3238_v15  ;;  %v3374_v15 = vld [vmem:[#allocation8 + $0x144] ss:$8 sps:$4 sm:$0xff]  }
 0x115   :  { %1166 = vmatpush1.bf16.msra.mxu0 %v3236_v18  ;;  %v3375_v18 = vld [vmem:[#allocation8 + $0x150] ss:$8 sps:$4 sm:$0xff]  }
 0x116   :  { %1167 = vmatprep.subr.bf16.mxu0 %v3244_v19  ;;  %v3380_v19 = vld [vmem:[#allocation8 + $0x164] ss:$8 sps:$4 sm:$0xff]  }
 0x119   :  { %1168 = vmatpush1.bf16.msra.mxu0 %v3242_v22  ;;  %v3381_v22 = vld [vmem:[#allocation8 + $0x170] ss:$8 sps:$4 sm:$0xff]  }
 0x11a   :  { %1169 = vmatprep.subr.bf16.mxu0 %v3250_v23  ;;  %v3386_v23 = vld [vmem:[#allocation8 + $0x184] ss:$8 sps:$4 sm:$0xff]  }
 0x11d   :  { %1170 = vmatpush1.bf16.msra.mxu0 %v3248_v26  ;;  %v3480_v26 = vld [vmem:[#allocation8 + $0x400] ss:$8 sps:$4 sm:$0xff]  }
 0x11e   :  { %1171 = vmatprep.subr.bf16.mxu0 %v3256_v27  ;;  %v3389_v27 = vld [vmem:[#allocation8 + $0x194] ss:$8 sps:$4 sm:$0xff]  }
 0x121   :  { %1172 = vmatpush1.bf16.msra.mxu0 %v3254_v30  ;;  %v3486_v30 = vld [vmem:[#allocation8 + $0x410] ss:$8 sps:$4 sm:$0xff]  }
 0x122   :  { %1173 = vmatprep.subr.bf16.mxu0 %v3262_v31  ;;  %v3392_v31 = vld [vmem:[#allocation8 + $0x1a4] ss:$8 sps:$4 sm:$0xff]  }
 0x125   :  { %1174 = vmatpush1.bf16.msra.mxu0 %v3260_v34  ;;  %v3492_v34 = vld [vmem:[#allocation8 + $0x420] ss:$8 sps:$4 sm:$0xff]  }
 0x126   :  { %1175 = vmatprep.subr.bf16.mxu0 %v3268_v35  ;;  %v3395_v35 = vld [vmem:[#allocation8 + $0x1b4] ss:$8 sps:$4 sm:$0xff]  }
 0x129   :  { %1176 = vmatpush1.bf16.msra.mxu0 %v3266_v36  ;;  %v3500_v36 = vld [vmem:[#allocation8 + $0x434] ss:$8 sps:$4 sm:$0xff]  }
 0x12a   :  { %1177 = vmatprep.subr.bf16.mxu0 %v3274_v37  ;;  %v3393_v37 = vld [vmem:[#allocation8 + $0x1b0] ss:$8 sps:$4 sm:$0xff]  }
 0x12d   :  { %1178 = vmatpush1.bf16.msra.mxu0 %v3272_v38  ;;  %v3498_v38 = vld [vmem:[#allocation8 + $0x430] ss:$8 sps:$4 sm:$0xff]  }
 0x12e   :  { %2997 = vmatprep.subr.bf16.mxu0 %v3299_v39  ;;  %v3398_v39 = vld [vmem:[#allocation8 + $0x1c4] ss:$8 sps:$4 sm:$0xff]  }
 0x130   :  { %1180 = vmatmul.mubr.bf16.vlgmr.msra.gmra.mrb[8].mxu0 %v3858_v42 }
 0x131   :  { %2998 = vmatpush3.bf16.msra.mxu0 %v3300_v40  ;;  %1261 = vmatprep.mubr.bf16.mxu0 %v3854_v14  ;;  %v3330_v14 = vld [vmem:[#allocation5 + $0x1d0] ss:$36 sps:$4 sm:$0xff]  }
 0x132   :  { %2999 = vmatprep.subr.bf16.mxu0 %v3304_v41  ;;  %v3506_v41 = vld [vmem:[#allocation8 + $0x444] ss:$8 sps:$4 sm:$0xff]  }
 0x135   :  { %3000 = vmatpush3.bf16.msra.mxu0 %v3305_v43  ;;  %v3396_v43 = vld [vmem:[#allocation8 + $0x1c0] ss:$8 sps:$4 sm:$0xff]  }
 0x136   :  { %3001 = vmatprep.subr.bf16.mxu0 %v3309_v44 }
 0x139   :  { %3002 = vmatpush3.bf16.msra.mxu0 %v3310_v45  ;;  %v3504_v45 = vld [vmem:[#allocation8 + $0x440] ss:$8 sps:$4 sm:$0xff]  }
 0x13a   :  { %3003 = vmatprep.subr.bf16.mxu0 %v3314_v46  ;;  %v3401_v46 = vld [vmem:[#allocation8 + $0x1d4] ss:$8 sps:$4 sm:$0xff]  }
 0x13d   :  { %3004 = vmatpush3.bf16.msra.mxu0 %v3315_v47 }
 0x13e   :  { %3005 = vmatprep.subr.bf16.mxu0 %v3319_v48 }
 0x141   :  { %3006 = vmatpush3.bf16.msra.mxu0 %v3320_v49  ;;  %v287_v49 = vsub.s32 2, %v3868_v56 }
 0x142   :  { %3007 = vmatprep.subr.bf16.mxu0 %v3324_v50  ;;  %v3512_v50 = vld [vmem:[#allocation8 + $0x454] ss:$8 sps:$4 sm:$0xff]  }
 0x145   :  { %3008 = vmatpush3.bf16.msra.mxu0 %v3325_v51  ;;  %v3399_v51 = vld [vmem:[#allocation8 + $0x1d0] ss:$8 sps:$4 sm:$0xff]  }
 0x146   :  { %3009 = vmatprep.subr.bf16.mxu0 %v3329_v52  ;;  %v291_v52 = vsub.s32 3, %v3868_v56 }
 0x149   :  { %3010 = vmatpush3.bf16.msra.mxu0 %v3330_v14  ;;  %v3510_v14 = vld [vmem:[#allocation8 + $0x450] ss:$8 sps:$4 sm:$0xff]  }
 0x14a   :  { %3011 = vmatprep.subr.bf16.mxu0 %v3334_v53  ;;  %v3404_v53 = vld [vmem:[#allocation8 + $0x1e4] ss:$8 sps:$4 sm:$0xff]  }
 0x14d   :  { %3012 = vmatpush3.bf16.msra.mxu0 %v3335_v54  ;;  %v288_v54 = vrot.slane %v3871_v58, %v287_v49 }
 0x14e   :  { %2327 = vmatprep.subr.bf16.mxu0 %v3482_v24  ;;  %v3420_v24 = vld [vmem:[#allocation8 + $0x240] ss:$8 sps:$4 sm:$0xff]  }
 0x150   :  { %1262 = vmatmul.mubr.bf16.vlgmr.msra.gmra.mrb[12].mxu0 %v3858_v42 }
 0x151   :  { %2328 = vmatpush1.bf16.msra.mxu0 %v3480_v26  ;;  %v3423_v26 = vld [vmem:[#allocation8 + $0x250] ss:$8 sps:$4 sm:$0xff]  }
 0x152   :  { %2329 = vmatprep.subr.bf16.mxu0 %v3488_v28  ;;  %v3426_v28 = vld [vmem:[#allocation8 + $0x260] ss:$8 sps:$4 sm:$0xff]  }
 0x155   :  { %2330 = vmatpush1.bf16.msra.mxu0 %v3486_v30  ;;  %v3429_v30 = vld [vmem:[#allocation8 + $0x270] ss:$8 sps:$4 sm:$0xff]  }
 0x156   :  { %2331 = vmatprep.subr.bf16.mxu0 %v3494_v32  ;;  %v3432_v32 = vld [vmem:[#allocation8 + $0x280] ss:$8 sps:$4 sm:$0xff]  }
 0x159   :  { %2332 = vmatpush1.bf16.msra.mxu0 %v3492_v34  ;;  %v3435_v34 = vld [vmem:[#allocation8 + $0x290] ss:$8 sps:$4 sm:$0xff]  }
 0x15a   :  { %2333 = vmatprep.subr.bf16.mxu0 %v3500_v36  ;;  %v3438_v36 = vld [vmem:[#allocation8 + $0x2a0] ss:$8 sps:$4 sm:$0xff]  }
 0x15d   :  { %2334 = vmatpush1.bf16.msra.mxu0 %v3498_v38  ;;  %v3441_v38 = vld [vmem:[#allocation8 + $0x2b0] ss:$8 sps:$4 sm:$0xff]  }
 0x15e   :  { %2335 = vmatprep.subr.bf16.mxu0 %v3506_v41  ;;  %v3444_v41 = vld [vmem:[#allocation8 + $0x2c0] ss:$8 sps:$4 sm:$0xff]  }
 0x161   :  { %2336 = vmatpush1.bf16.msra.mxu0 %v3504_v45  ;;  %v3449_v45 = vld [vmem:[#allocation8 + $0x2d4] ss:$8 sps:$4 sm:$0xff]  }
 0x162   :  { %2337 = vmatprep.subr.bf16.mxu0 %v3512_v50  ;;  %v3452_v50 = vld [vmem:[#allocation8 + $0x2e4] ss:$8 sps:$4 sm:$0xff]  }
 0x165   :  { %2338 = vmatpush1.bf16.msra.mxu0 %v3510_v14 }
 0x166   :  { %2339 = vmatprep.subr.bf16.mxu0 %v3518_v55 }
 0x183   :  { %v1099_v62 = vpop.f32.mrb[0].mxu0 }
 0x184   :  { %v1100_v63 = vadd.f32 %v1099_v62, %v280_v60  ;;  %v1101_v42 = vpop.f32.mrb[1].mxu0  ;;  %v3402_v60 = vld [vmem:[#allocation8 + $0x1e0] ss:$8 sps:$4 sm:$0xff]  }
 0x185   :  { %v1102_v0 = vadd.f32 %v1101_v42, %v284_v61  ;;  %v1103_v1 = vpop.f32.mrb[2].mxu0  ;;  %v292_v61 = vrot.slane %v3871_v58, %v291_v52  ;;  %v3516_v62 = vld [vmem:[#allocation8 + $0x460] ss:$8 sps:$4 sm:$0xff]  }
 0x186   :  { %v1269_v2 = vmax.f32 %v1100_v63, 0.0  ;;  %v1104_v3 = vpop.f32.mrb[3].mxu0  ;;  %v3407_v63 = vld [vmem:[#allocation8 + $0x1f4] ss:$8 sps:$4 sm:$0xff]   ;;  %2340 = vmatpush1.bf16.msra.mxu0 %v3516_v62  ;;  %v3450_v52 = vld [vmem:[#allocation8 + $0x2e0] ss:$8 sps:$4 sm:$0xff]  }
 0x187   :  { %v1270_v4 = vmax.f32 %v1102_v0, 0.0 }
 0x188   :  { %v1278_v7 = vpack.c.bf16 %v1269_v2, %v1269_v2  ;;  %v3524_v2 = vld [vmem:[#allocation8 + $0x474] ss:$8 sps:$4 sm:$0xff]  }
 0x189   :  { %v1279_v5 = vpack.c.bf16 %v1270_v4, %v1270_v4  ;;  %2341 = vmatprep.subr.bf16.mxu0 %v3524_v2 }
 0x18b   :  { %2195 = vmatprep.mubr.bf16.mxu1 %v1279_v5  ;;  %v3405_v5 = vld [vmem:[#allocation8 + $0x1f0] ss:$8 sps:$4 sm:$0xff]  }
 0x18c   :  { %2196 = vmatmul.mubr.bf16.vlgmr.msra.gmra.mrb[4].mxu1 %v1278_v7 }
 0x18d   :  { %2205 = vmatpush1.bf16.msra.mxu1 %v3360_v6  ;;  %v3880_v40 = vpop.f32.mrb[0].mxu1  ;;  %v3522_v6 = vld [vmem:[#allocation8 + $0x470] ss:$8 sps:$4 sm:$0xff]  }
 0x18e   :  { %2206 = vmatprep.subr.bf16.mxu1 %v3365_v8  ;;  %v3882_v44 = vpop.f32.mrb[1].mxu1  ;;  %2342 = vmatpush1.bf16.msra.mxu0 %v3522_v6  ;;  %v3456_v6 = vld [vmem:[#allocation8 + $0x300] ss:$8 sps:$4 sm:$0xff]  }
 0x18f   :  { %v1226_v47 = vpop.f32.mrb[2].mxu1 }
 0x190   :  { %v1227_v48 = vpop.f32.mrb[3].mxu1  ;;  %v3447_v47 = vld [vmem:[#allocation8 + $0x2d0] ss:$8 sps:$4 sm:$0xff]  }
 0x191   :  { %2207 = vmatpush1.bf16.msra.mxu1 %v3363_v9  ;;  %v3410_v9 = vld [vmem:[#allocation8 + $0x204] ss:$8 sps:$4 sm:$0xff]   ;;  %v299_v48 = vsub.s32 5, %v3868_v56 }
 0x192   :  { %2208 = vmatprep.subr.bf16.mxu1 %v3368_v10 }
 0x193   :  { %v300_v14 = vrot.slane %v3871_v58, %v299_v48  ;;  %v3501_v48 = vld [vmem:[#allocation8 + $0x3b0] ss:$8 sps:$4 sm:$0xff]  }
 0x195   :  { %2209 = vmatpush1.bf16.msra.mxu1 %v3366_v11 }
 0x196   :  { %2210 = vmatprep.subr.bf16.mxu1 %v3371_v12  ;;  %v3408_v12 = vld [vmem:[#allocation8 + $0x200] ss:$8 sps:$4 sm:$0xff]  }
 0x199   :  { %2211 = vmatpush1.bf16.msra.mxu1 %v3369_v13  ;;  %v3728_v13 = vmov 0  }
 0x19a   :  { %2212 = vmatprep.subr.bf16.mxu1 %v3374_v15  ;;  %2359 = vmatprep.mubr.bf16.mxu0 %v3728_v13  ;;  %v3465_v13 = vld [vmem:[#allocation8 + $0x330] ss:$8 sps:$4 sm:$0xff]  }
 0x19d   :  { %2213 = vmatpush1.bf16.msra.mxu1 %v3372_v16  ;;  %v3413_v16 = vld [vmem:[#allocation8 + $0x214] ss:$8 sps:$4 sm:$0xff]  }
 0x19e   :  { %2214 = vmatprep.subr.bf16.mxu1 %v3377_v17  ;;  %v3528_v17 = vld [vmem:[#allocation10 + $0x40] sm:$0xff]  }
 0x19f   :  { %3019 = vmatprep.subr.bf16.mxu0 %v3528_v17  ;;  %v3473_v17 = vld [vmem:[#allocation8 + $0x354] ss:$8 sps:$4 sm:$0xff]  }
 0x1a1   :  { %2215 = vmatpush1.bf16.msra.mxu1 %v3375_v18  ;;  %v3411_v18 = vld [vmem:[#allocation8 + $0x210] ss:$8 sps:$4 sm:$0xff]  }
 0x1a2   :  { %2216 = vmatprep.subr.bf16.mxu1 %v3380_v19  ;;  %v3416_v19 = vld [vmem:[#allocation8 + $0x224] ss:$8 sps:$4 sm:$0xff]  }
 0x1a5   :  { %2217 = vmatpush1.bf16.msra.mxu1 %v3378_v20  ;;  %v3414_v20 = vld [vmem:[#allocation8 + $0x220] ss:$8 sps:$4 sm:$0xff]  }
 0x1a6   :  { %2218 = vmatprep.subr.bf16.mxu1 %v3383_v21  ;;  %v3419_v21 = vld [vmem:[#allocation8 + $0x234] ss:$8 sps:$4 sm:$0xff]  }
 0x1a9   :  { %2219 = vmatpush1.bf16.msra.mxu1 %v3381_v22  ;;  %v3417_v22 = vld [vmem:[#allocation8 + $0x230] ss:$8 sps:$4 sm:$0xff]  }
 0x1aa   :  { %2220 = vmatprep.subr.bf16.mxu1 %v3386_v23  ;;  %v3422_v23 = vld [vmem:[#allocation8 + $0x244] ss:$8 sps:$4 sm:$0xff]  }
 0x1ad   :  { %2221 = vmatpush1.bf16.msra.mxu1 %v3384_v25  ;;  %v3425_v25 = vld [vmem:[#allocation8 + $0x254] ss:$8 sps:$4 sm:$0xff]  }
 0x1ae   :  { %2222 = vmatprep.subr.bf16.mxu1 %v3389_v27  ;;  %v3428_v27 = vld [vmem:[#allocation8 + $0x264] ss:$8 sps:$4 sm:$0xff]  }
 0x1b1   :  { %2223 = vmatpush1.bf16.msra.mxu1 %v3387_v29  ;;  %v3431_v29 = vld [vmem:[#allocation8 + $0x274] ss:$8 sps:$4 sm:$0xff]  }
 0x1b2   :  { %2224 = vmatprep.subr.bf16.mxu1 %v3392_v31  ;;  %v3434_v31 = vld [vmem:[#allocation8 + $0x284] ss:$8 sps:$4 sm:$0xff]  }
 0x1b5   :  { %2225 = vmatpush1.bf16.msra.mxu1 %v3390_v33  ;;  %v3437_v33 = vld [vmem:[#allocation8 + $0x294] ss:$8 sps:$4 sm:$0xff]  }
 0x1b6   :  { %2226 = vmatprep.subr.bf16.mxu1 %v3395_v35  ;;  %v3440_v35 = vld [vmem:[#allocation8 + $0x2a4] ss:$8 sps:$4 sm:$0xff]  }
 0x1b9   :  { %2227 = vmatpush1.bf16.msra.mxu1 %v3393_v37  ;;  %v3443_v37 = vld [vmem:[#allocation8 + $0x2b4] ss:$8 sps:$4 sm:$0xff]  }
 0x1ba   :  { %2228 = vmatprep.subr.bf16.mxu1 %v3398_v39  ;;  %v3446_v39 = vld [vmem:[#allocation8 + $0x2c4] ss:$8 sps:$4 sm:$0xff]  }
 0x1bd   :  { %2229 = vmatpush1.bf16.msra.mxu1 %v3396_v43  ;;  %v307_v43 = vsub.s32 7, %v3868_v56 }
 0x1be   :  { %2230 = vmatprep.subr.bf16.mxu1 %v3401_v46  ;;  %v295_v46 = vsub.s32 4, %v3868_v56 }
 0x1bf   :  { %v308_v49 = vrot.slane %v3871_v58, %v307_v43  ;;  %v3495_v43 = vld [vmem:[#allocation8 + $0x3a0] ss:$8 sps:$4 sm:$0xff]  }
 0x1c1   :  { %2231 = vmatpush1.bf16.msra.mxu1 %v3399_v51  ;;  %v296_v51 = vrot.slane %v3871_v58, %v295_v46  ;;  %v3533_v46 = vld [vmem:[#allocation10 + $0x10] sm:$0xff]  }
 0x1c2   :  { %2232 = vmatprep.subr.bf16.mxu1 %v3404_v53  ;;  %v1225_v53 = vadd.f32 %v3882_v44, %v308_v49  ;;  %v3509_v49 = vld [vmem:[#allocation8 + $0x3c4] ss:$8 sps:$4 sm:$0xff]  }
 0x1c3   :  { %v1140_v42 = vpop.f32.mrb[4].mxu0 }
 0x1c4   :  { %v1141_v0 = vadd.f32 %v1140_v42, %v288_v54  ;;  %v1142_v1 = vpop.f32.mrb[5].mxu0  ;;  %v3455_v54 = vld [vmem:[#allocation8 + $0x2f4] ss:$8 sps:$4 sm:$0xff]   ;;  %v3453_v42 = vld [vmem:[#allocation8 + $0x2f0] ss:$8 sps:$4 sm:$0xff]  }
 0x1c5   :  { %v1143_v3 = vadd.f32 %v1142_v1, %v292_v61  ;;  %2233 = vmatpush1.bf16.msra.mxu1 %v3402_v60  ;;  %v1144_v4 = vpop.f32.mrb[6].mxu0 }
 0x1c6   :  { %v1271_v7 = vmax.f32 %v1141_v0, 0.0  ;;  %v1145_v8 = vpop.f32.mrb[7].mxu0  ;;  %2234 = vmatprep.subr.bf16.mxu1 %v3407_v63  ;;  %v1276_v0 = vmax.f32 %v1225_v53, 0.0  ;;  %v3515_v53 = vld [vmem:[#allocation8 + $0x3d4] ss:$8 sps:$4 sm:$0xff]  }
 0x1c7   :  { %v1272_v10 = vmax.f32 %v1143_v3, 0.0  ;;  %v3458_v3 = vld [vmem:[#allocation8 + $0x304] ss:$8 sps:$4 sm:$0xff]   ;;  %v3461_v8 = vld [vmem:[#allocation8 + $0x314] ss:$8 sps:$4 sm:$0xff]  }
 0x1c8   :  { %v1280_v15 = vpack.c.bf16 %v1271_v7, %v1271_v7  ;;  %v1285_v7 = vpack.c.bf16 %v1276_v0, %v1276_v0  ;;  %v3525_v0 = vld [vmem:[#allocation8 + $0x3f0] ss:$8 sps:$4 sm:$0xff]  }
 0x1c9   :  { %v1281_v11 = vpack.c.bf16 %v1272_v10, %v1272_v10  ;;  %2235 = vmatpush1.bf16.msra.mxu1 %v3405_v5  ;;  %v3464_v10 = vld [vmem:[#allocation8 + $0x324] ss:$8 sps:$4 sm:$0xff]  }
 0x1ca   :  { %2245 = vmatprep.subr.bf16.mxu1 %v3410_v9  ;;  %v3459_v9 = vld [vmem:[#allocation8 + $0x310] ss:$8 sps:$4 sm:$0xff]  }
 0x1cb   :  { %2236 = vmatprep.mubr.bf16.mxu1 %v1281_v11  ;;  %v3462_v11 = vld [vmem:[#allocation8 + $0x320] ss:$8 sps:$4 sm:$0xff]  }
 0x1cc   :  { %2237 = vmatmul.mubr.bf16.vlgmr.msra.gmra.mrb[4].mxu1 %v1280_v15  ;;  %v3470_v15 = vld [vmem:[#allocation8 + $0x344] ss:$8 sps:$4 sm:$0xff]  }
 0x1cd   :  { %2246 = vmatpush1.bf16.msra.mxu1 %v3408_v12  ;;  %v3467_v12 = vld [vmem:[#allocation8 + $0x334] ss:$8 sps:$4 sm:$0xff]  }
 0x1ce   :  { %2247 = vmatprep.subr.bf16.mxu1 %v3413_v16  ;;  %v3468_v16 = vld [vmem:[#allocation8 + $0x340] ss:$8 sps:$4 sm:$0xff]  }
 0x1d1   :  { %2248 = vmatpush1.bf16.msra.mxu1 %v3411_v18  ;;  %v3471_v18 = vld [vmem:[#allocation8 + $0x350] ss:$8 sps:$4 sm:$0xff]  }
 0x1d2   :  { %2249 = vmatprep.subr.bf16.mxu1 %v3416_v19  ;;  %v3476_v19 = vld [vmem:[#allocation8 + $0x364] ss:$8 sps:$4 sm:$0xff]  }
 0x1d5   :  { %2250 = vmatpush1.bf16.msra.mxu1 %v3414_v20  ;;  %v3474_v20 = vld [vmem:[#allocation8 + $0x360] ss:$8 sps:$4 sm:$0xff]  }
 0x1d6   :  { %2251 = vmatprep.subr.bf16.mxu1 %v3419_v21  ;;  %v3479_v21 = vld [vmem:[#allocation8 + $0x374] ss:$8 sps:$4 sm:$0xff]  }
 0x1d9   :  { %2252 = vmatpush1.bf16.msra.mxu1 %v3417_v22 }
 0x1da   :  { %2253 = vmatprep.subr.bf16.mxu1 %v3422_v23  ;;  %v2680_v23 = vld [vmem:[#allocation7 + $0x8] ss:$0 sm:$0xff] }
 0x1dd   :  { %2254 = vmatpush1.bf16.msra.mxu1 %v3420_v24 }
 0x1de   :  { %2255 = vmatprep.subr.bf16.mxu1 %v3425_v25  ;;  %v3477_v25 = vld [vmem:[#allocation8 + $0x370] ss:$8 sps:$4 sm:$0xff]  }
 0x1e1   :  { %2256 = vmatpush1.bf16.msra.mxu1 %v3423_v26 }
 0x1e2   :  { %2257 = vmatprep.subr.bf16.mxu1 %v3428_v27 }
 0x1e5   :  { %2258 = vmatpush1.bf16.msra.mxu1 %v3426_v28  ;;  %v3485_v28 = vld [vmem:[#allocation8 + $0x384] ss:$8 sps:$4 sm:$0xff]  }
 0x1e6   :  { %2259 = vmatprep.subr.bf16.mxu1 %v3431_v29 }
 0x1e9   :  { %2260 = vmatpush1.bf16.msra.mxu1 %v3429_v30 }
 0x1ea   :  { %2261 = vmatprep.subr.bf16.mxu1 %v3434_v31  ;;  %v3483_v31 = vld [vmem:[#allocation8 + $0x380] ss:$8 sps:$4 sm:$0xff]  }
 0x1ed   :  { %2262 = vmatpush1.bf16.msra.mxu1 %v3432_v32 }
 0x1ee   :  { %2263 = vmatprep.subr.bf16.mxu1 %v3437_v33  ;;  %v3491_v33 = vld [vmem:[#allocation8 + $0x394] ss:$8 sps:$4 sm:$0xff]  }
 0x1f1   :  { %2264 = vmatpush1.bf16.msra.mxu1 %v3435_v34  ;;  %v3529_v34 = vld [vmem:[#allocation10] sm:$0xff]  }
 0x1f2   :  { %2265 = vmatprep.subr.bf16.mxu1 %v3440_v35 }
 0x1f5   :  { %2266 = vmatpush1.bf16.msra.mxu1 %v3438_v36  ;;  %v3530_v36 = vld [vmem:[#allocation10 + $0x48] sm:$0xff]  }
 0x1f6   :  { %2267 = vmatprep.subr.bf16.mxu1 %v3443_v37  ;;  %v3489_v37 = vld [vmem:[#allocation8 + $0x390] ss:$8 sps:$4 sm:$0xff]  }
 0x1f9   :  { %2268 = vmatpush1.bf16.msra.mxu1 %v3441_v38  ;;  %v3497_v38 = vld [vmem:[#allocation8 + $0x3a4] ss:$8 sps:$4 sm:$0xff]  }
 0x1fa   :  { %2269 = vmatprep.subr.bf16.mxu1 %v3446_v39  ;;  %v3531_v39 = vld [vmem:[#allocation10 + $0x8] sm:$0xff]  }
 0x1fd   :  { %2270 = vmatpush1.bf16.msra.mxu1 %v3444_v41  ;;  %v3532_v41 = vld [vmem:[#allocation10 + $0x50] sm:$0xff]  }
 0x1fe   :  { %2271 = vmatprep.subr.bf16.mxu1 %v3449_v45  ;;  %v3503_v45 = vld [vmem:[#allocation8 + $0x3b4] ss:$8 sps:$4 sm:$0xff]  }
 0x201   :  { %2272 = vmatpush1.bf16.msra.mxu1 %v3447_v47  ;;  %v3534_v47 = vld [vmem:[#allocation10 + $0x58] sm:$0xff]  }
 0x202   :  { %2273 = vmatprep.subr.bf16.mxu1 %v3452_v50  ;;  %v3535_v50 = vld [vmem:[#allocation10 + $0x18] sm:$0xff]  }
 0x203   :  { %v1181_v55 = vpop.f32.mrb[8].mxu0 }
 0x204   :  { %v1182_v60 = vadd.f32 %v1181_v55, %v296_v51  ;;  %v1183_v61 = vpop.f32.mrb[9].mxu0  ;;  %v3536_v51 = vld [vmem:[#allocation10 + $0x60] sm:$0xff]   ;;  %v3513_v55 = vld [vmem:[#allocation8 + $0x3d0] ss:$8 sps:$4 sm:$0xff]  }
 0x205   :  { %v1184_v62 = vadd.f32 %v1183_v61, %v300_v14  ;;  %2274 = vmatpush1.bf16.msra.mxu1 %v3450_v52  ;;  %v1185_v63 = vpop.f32.mrb[10].mxu0  ;;  %v3507_v52 = vld [vmem:[#allocation8 + $0x3c0] ss:$8 sps:$4 sm:$0xff]   ;;  %v303_v14 = vsub.s32 6, %v3868_v56  ;;  %v3521_v61 = vld [vmem:[#allocation8 + $0x3e4] ss:$8 sps:$4 sm:$0xff]  }
 0x206   :  { %v1273_v1 = vmax.f32 %v1182_v60, 0.0  ;;  %v1186_v2 = vpop.f32.mrb[11].mxu0  ;;  %2275 = vmatprep.subr.bf16.mxu1 %v3455_v54  ;;  %v3537_v54 = vld [vmem:[#allocation10 + $0x20] sm:$0xff]   ;;  %v3546_v56 = vld [vmem:[#allocation11 + $0x10] sm:$0xff]  }
 0x207   :  { %v1274_v4 = vmax.f32 %v1184_v62, 0.0  ;;  %v304_v60 = vrot.slane %v3871_v58, %v303_v14  ;;  %v3519_v62 = vld [vmem:[#allocation8 + $0x3e0] ss:$8 sps:$4 sm:$0xff]   ;;  %v3540_v58 = vld [vmem:[#allocation10 + $0x70] sm:$0xff]  }
 0x208   :  { %v1282_v44 = vpack.c.bf16 %v1273_v1, %v1273_v1 }
 0x209   :  { %v1283_v5 = vpack.c.bf16 %v1274_v4, %v1274_v4  ;;  %2276 = vmatpush1.bf16.msra.mxu1 %v3453_v42  ;;  %v1223_v63 = vadd.f32 %v3880_v40, %v304_v60  ;;  %v3527_v42 = vld [vmem:[#allocation8 + $0x3f4] ss:$8 sps:$4 sm:$0xff]   ;;  %v3539_v4 = vld [vmem:[#allocation10 + $0x28] sm:$0xff]   ;;  %v3729_v40 = vmov 0.0  }
 0x20a   :  { %2286 = vmatprep.subr.bf16.mxu1 %v3458_v3  ;;  %v3538_v3 = vld [vmem:[#allocation10 + $0x68] sm:$0xff]  }
 0x20b   :  { %2277 = vmatprep.mubr.bf16.mxu1 %v1283_v5  ;;  %v1275_v1 = vmax.f32 %v1223_v63, 0.0  ;;  %v3541_v5 = vld [vmem:[#allocation10 + $0x30] sm:$0xff]  }
 0x20c   :  { %2278 = vmatmul.mubr.bf16.vlgmr.msra.gmra.mrb[4].mxu1 %v1282_v44 }
 0x20d   :  { %2287 = vmatpush1.bf16.msra.mxu1 %v3456_v6  ;;  %2318 = vmatprep.mubr.bf16.mxu1 %v1285_v7  ;;  %v1284_v2 = vpack.c.bf16 %v1275_v1, %v1275_v1  ;;  %v3542_v6 = vld [vmem:[#allocation10 + $0x78] sm:$0xff]  }
 0x20e   :  { %2288 = vmatprep.subr.bf16.mxu1 %v3461_v8  ;;  %v3543_v7 = vld [vmem:[#allocation10 + $0x38] sm:$0xff]  }
 0x211   :  { %2289 = vmatpush1.bf16.msra.mxu1 %v3459_v9 }
 0x212   :  { %2290 = vmatprep.subr.bf16.mxu1 %v3464_v10 }
 0x215   :  { %2291 = vmatpush1.bf16.msra.mxu1 %v3462_v11  ;;  %v1431_v11 = vld [vmem:[%s3927_s4] sm:$0x3] }
 0x216   :  { %2292 = vmatprep.subr.bf16.mxu1 %v3467_v12  ;;  %v1436_v12 = vrot.slane %v1431_v11, %v279_v57  ;;  %v3545_v57 = vld [vmem:[#allocation11 + $0x8] sm:$0xff]  }
 0x219   :  { %2293 = vmatpush1.bf16.msra.mxu1 %v3465_v13  ;;  %v1440_v13 = vrot.slane %v1431_v11, %v283_v59  ;;  %v3547_v59 = vld [vmem:[#allocation11 + $0x18] sm:$0xff]  }
 0x21a   :  { %2294 = vmatprep.subr.bf16.mxu1 %v3470_v15 }
 0x21d   :  { %2295 = vmatpush1.bf16.msra.mxu1 %v3468_v16 }
 0x21e   :  { %2296 = vmatprep.subr.bf16.mxu1 %v3473_v17 }
 0x221   :  { %2297 = vmatpush1.bf16.msra.mxu1 %v3471_v18 }
 0x222   :  { %2298 = vmatprep.subr.bf16.mxu1 %v3476_v19 }
 0x223   :  { %v3013_v22 = vpop.f32.mrb[12].mxu0 }
 0x224   :  { %v3014_v24 = vpop.f32.mrb[13].mxu0 }
 0x225   :  { %2299 = vmatpush1.bf16.msra.mxu1 %v3474_v20  ;;  %v3015_v26 = vadd.f32 %v3014_v24, %v3013_v22  ;;  %v3016_v27 = vpop.f32.mrb[14].mxu0 }
 0x226   :  { %2300 = vmatprep.subr.bf16.mxu1 %v3479_v21  ;;  %v3017_v29 = vpop.f32.mrb[15].mxu0 }
 0x227   :  { %v1264_v30 = vadd.f32 %v3015_v26, %v2680_v23  ;;  %v3544_v26 = vld [vmem:[#allocation11] sm:$0xff]   ;;  %v3549_v29 = vld [vmem:[#allocation11 + $0x28] sm:$0xff]  }
 0x229   :  { %2301 = vmatpush1.bf16.msra.mxu1 %v3477_v25  ;;  %v1277_v32 = vmax.f32 %v1264_v30, 0.0  ;;  %v3550_v30 = vld [vmem:[#allocation11 + $0x30] sm:$0xff]  }
 0x22a   :  { %2302 = vmatprep.subr.bf16.mxu1 %v3485_v28  ;;  %v3548_v28 = vld [vmem:[#allocation11 + $0x20] sm:$0xff]  }
 0x22b   :  { %v1286_v35 = vpack.c.bf16 %v1277_v32, %v1277_v32 }
 0x22d   :  { %2303 = vmatpush1.bf16.msra.mxu1 %v3483_v31  ;;  %2360 = vmatmul.mubr.bf16.vlgmr.msra.gmra.mrb[16].mxu0 %v1286_v35  ;;  %v3551_v31 = vld [vmem:[#allocation11 + $0x38] sm:$0xff]  }
 0x22e   :  { %2304 = vmatprep.subr.bf16.mxu1 %v3491_v33  ;;  %3020 = vmatpush3.bf16.msra.mxu0 %v3529_v34  ;;  %v2971_v33 = vld [vmem:[%s3929_s6] ss:$0 sm:$0xff]  ;;  %s3684_s6 = scalar_lea.vmem %s2669_s22, 64 }
 0x22f   :  { %3021 = vmatprep.subr.bf16.mxu0 %v3530_v36  ;;  %p3685_p6 = scmp.ne.s32.totalorder %s2669_s22, %s3684_s6  ;;  %p3690_p8 = scmp.lt.s32.totalorder %s3684_s6, %s3684_s6 }
 0x231   :  { %2305 = vmatpush1.bf16.msra.mxu1 %v3489_v37  ;;  %p3691_p9 = por %p3690_p8, %p3689_p7 }
 0x232   :  { %2306 = vmatprep.subr.bf16.mxu1 %v3497_v38  ;;  %3022 = vmatpush3.bf16.msra.mxu0 %v3531_v39 }
 0x233   :  { %3023 = vmatprep.subr.bf16.mxu0 %v3532_v41  ;;  %p3692_p10 = pnand %p3691_p9, %p3685_p6 }
 0x235   :  { %2307 = vmatpush1.bf16.msra.mxu1 %v3495_v43  ;;  %v2988_v43 = vld [vmem:[%s3931_s8] ss:$0 sm:$0xff] }
 0x236   :  { %2308 = vmatprep.subr.bf16.mxu1 %v3503_v45  ;;  %3024 = vmatpush3.bf16.msra.mxu0 %v3533_v46 }
 0x237   :  { %3025 = vmatprep.subr.bf16.mxu0 %v3534_v47 }
 0x239   :  { %2309 = vmatpush1.bf16.msra.mxu1 %v3501_v48 }
 0x23a   :  { %2310 = vmatprep.subr.bf16.mxu1 %v3509_v49  ;;  %3026 = vmatpush3.bf16.msra.mxu0 %v3535_v50 }
 0x23b   :  { %3027 = vmatprep.subr.bf16.mxu0 %v3536_v51 }
 0x23d   :  { %2311 = vmatpush1.bf16.msra.mxu1 %v3507_v52 }
 0x23e   :  { %2312 = vmatprep.subr.bf16.mxu1 %v3515_v53  ;;  %3028 = vmatpush3.bf16.msra.mxu0 %v3537_v54 }
 0x23f   :  { %3029 = vmatprep.subr.bf16.mxu0 %v3538_v3 }
 0x241   :  { %2313 = vmatpush1.bf16.msra.mxu1 %v3513_v55 }
 0x242   :  { %2314 = vmatprep.subr.bf16.mxu1 %v3521_v61  ;;  %3030 = vmatpush3.bf16.msra.mxu0 %v3539_v4 }
 0x243   :  { %3031 = vmatprep.subr.bf16.mxu0 %v3540_v58 }
 0x245   :  { %2315 = vmatpush1.bf16.msra.mxu1 %v3519_v62 }
 0x246   :  { %2316 = vmatprep.subr.bf16.mxu1 %v3527_v42  ;;  %3032 = vmatpush3.bf16.msra.mxu0 %v3541_v5 }
 0x247   :  { %3033 = vmatprep.subr.bf16.mxu0 %v3542_v6 }
 0x249   :  { %2317 = vmatpush1.bf16.msra.mxu1 %v3525_v0 }
 0x24a   :  { %3034 = vmatpush3.bf16.msra.mxu0 %v3543_v7 }
 0x24b   :  { %3050 = vmatprep.subr.bf16.mxu0 %v3729_v40 }
 0x24c   :  { %2319 = vmatmul.mubr.bf16.vlgmr.msra.gmra.mrb[4].mxu1 %v1284_v2 }
 0x300   :  { %v2361_v44 = vpop.f32.mrb[16].mxu0 }
 0x301   :  { %v2363_v8 = vpop.f32.mrb[17].mxu0 }
 0x302   :  { %v2365_v9 = vpop.f32.mrb[18].mxu0 }
 0x303   :  { %v2366_v10 = vpop.f32.mrb[19].mxu0 }
 0x31f   :  { %v2320_v15 = vpop.f32.mrb[4].mxu1 }
 0x320   :  { %v3070_v16 = vadd.f32 %v2320_v15, %v1436_v12  ;;  %v2322_v17 = vpop.f32.mrb[5].mxu1 }
 0x321   :  { %v3072_v18 = vadd.f32 %v2322_v17, %v1440_v13  ;;  %v2324_v19 = vpop.f32.mrb[6].mxu1 }
 0x322   :  { %v3071_v20 = vadd.f32 %v3070_v16, %v2361_v44  ;;  %v2325_v21 = vpop.f32.mrb[7].mxu1 }
 0x323   :  { %v3073_v22 = vadd.f32 %v3072_v18, %v2363_v8 }
 0x324   :  { %v2368_v23 = vmax.f32 %v3071_v20, 0.0 }
 0x325   :  { %v2369_v24 = vmax.f32 %v3073_v22, 0.0 }
 0x326   :  { %v2370_v27 = vpack.c.bf16 %v2368_v23, %v2368_v23 }
 0x327   :  { %v2371_v25 = vpack.c.bf16 %v2369_v24, %v2369_v24 }
 0x329   :  { %2539 = vmatprep.mubr.bf16.mxu0 %v2371_v25 }
 0x32a   :  { %2540 = vmatmul.mubr.bf16.vlgmr.msra.gmra.mrb[20].mxu0 %v2370_v27 }
 0x32b   :  { %3051 = vmatpush3.bf16.msra.mxu0 %v3544_v26  ;;  %3066 = vmatprep.mubr.msk.bf16.mxu0 %vm3730_vm0, %v3729_v40 }
 0x32c   :  { %3052 = vmatprep.subr.bf16.mxu0 %v3729_v40 }
 0x32f   :  { %3053 = vmatpush3.bf16.msra.mxu0 %v3545_v57 }
 0x330   :  { %3054 = vmatprep.subr.bf16.mxu0 %v3729_v40 }
 0x333   :  { %3055 = vmatpush3.bf16.msra.mxu0 %v3546_v56 }
 0x334   :  { %3056 = vmatprep.subr.bf16.mxu0 %v3729_v40 }
 0x337   :  { %3057 = vmatpush3.bf16.msra.mxu0 %v3547_v59 }
 0x338   :  { %3058 = vmatprep.subr.bf16.mxu0 %v3729_v40 }
 0x33b   :  { %3059 = vmatpush3.bf16.msra.mxu0 %v3548_v28 }
 0x33c   :  { %3060 = vmatprep.subr.bf16.mxu0 %v3729_v40 }
 0x33f   :  { %3061 = vmatpush3.bf16.msra.mxu0 %v3549_v29 }
 0x340   :  { %3062 = vmatprep.subr.bf16.mxu0 %v3729_v40 }
 0x343   :  { %3063 = vmatpush3.bf16.msra.mxu0 %v3550_v30 }
 0x344   :  { %3064 = vmatprep.subr.bf16.mxu0 %v3729_v40 }
 0x347   :  { %3065 = vmatpush3.bf16.msra.mxu0 %v3551_v31 }
 0x3fd   :  { %v3035_v32 = vpop.f32.mrb[20].mxu0 }
 0x3fe   :  { %v3036_v34 = vpop.f32.mrb[21].mxu0 }
 0x3ff   :  { %v3037_v35 = vadd.f32 %v3036_v34, %v3035_v32  ;;  %v3038_v36 = vpop.f32.mrb[22].mxu0 }
 0x400   :  { %v3039_v37 = vpop.f32.mrb[23].mxu0 }
 0x401   :  { %v2542_v38 = vadd.f32 %v3037_v35, %v2971_v33 }
 0x403   :  { %v2547_v39 = vmax.f32 %v2542_v38, 0.0 }
 0x405   :  { %v2548_v41 = vpack.c.bf16 %v2547_v39, %v2547_v39 }
 0x407   :  { %3067 = vmatmul.mubr.bf16.vlgmr.msra.gmra.mrb[24].mxu0 %v2548_v41 }
 0x4da   :  { %v2654_v45 = vpop.f32.mrb[24].mxu0 }
 0x4db   :  { %v2655_v46 = vadd.f32 %v2988_v43, %v2654_v45  ;;  %v3068_v47 = vpop.f32.mrb[25].mxu0 }
 0x4dc   :  { %v2657_v48 = vpop.f32.mrb[26].mxu0 }
 0x4dd   :  { %v2660_v49 = vpack.c.bf16 %v2655_v46, %v2655_v46  ;;  %v3069_v50 = vpop.f32.mrb[27].mxu0 }
 0x4df   :  { %2661 = vst [vmem:[#allocation13] sm:$0xf] %v2660_v49 }
 0x4e0   :  { %3695 = shalt.err (!%p3692_p10)
}
 0x4e1   :  { %s3696_s8 = scalar_lea.hbm %s3932_s9, 64 }
 0x4e2   :  { %p3697_p11 = scmp.ne.s32.totalorder %s3932_s9, %s3696_s8  ;;  %p3700_p12 = scmp.lt.u32.totalorder %s3696_s8, %s3932_s9 }
 0x4e4   :  { %p3702_p13 = pnand %p3700_p12, %p3697_p11 }
 0x4e6   :  { %3705 = shalt.err (!%p3702_p13)
}
 0x4e7   :  { %2671 = dma.vmem_to_hbm [thread:$0]  %s2669_s22, 64, %s3932_s9, [#allocation4]  }
 0x4e8   :  { %3714 = dma.done.wait [#allocation4], 64  }
 0x4e9   :  { %3715 = vsyncadd [#allocation4], 4294967232 }
 0x4ea   :  { %2675 = vsyncpa [#allocation3], 1 }
 0x4eb   :  { %2676 = vsyncpa [#allocation6], 1 }
 0x4ec   :  { %2677 = vsyncpa [#allocation9], 1 }
 0x4ed   :  { %2678 = vsyncpa [#allocation12], 1 }
 0x4ee   :  { %2679 = vsyncpa [#allocation4], 1 }

</bundles_post_ra>
